<compile_context>
chip_gen: v7x
topology: tpu7x:2x2x1
jax: 0.10.0
libtpu: 0.0.40
codegen_flags: <defaults>
</compile_context>

<pallas_src>
import functools

import jax
import jax.numpy as jnp
from jax.experimental import pallas as pl
from jax.experimental.pallas import tpu as pltpu

BN_EPS = 1e-5
LANE = 128
SUBLANE = 8
NTAPS = 9  # 3x3 conv


def _round_up(x, m):
    return (x + m - 1) // m * m


def _k_plan(cin):
    """Dense-K packing plan for a 3x3 conv with `cin` real input channels.

    Returns (per_blk, blk_w, nblk): `per_blk` taps are lane-packed into each
    `blk_w`-wide K block; `nblk` blocks in total.  Packing only kicks in when
    more than one tap fits in a 128-lane block; otherwise it degenerates to the
    plain one-block-per-tap layout.
    """
    cpad = _round_up(cin, LANE)
    if cin <= LANE // 2:
        per_blk, blk_w = LANE // cin, LANE
    else:
        per_blk, blk_w = 1, cpad
    nblk = -(-NTAPS // per_blk)
    return per_blk, blk_w, nblk


# ---------------------------------------------------------------------------
# One-time weight dense-packing kernel (mirrors the in-kernel activation rolls)
# ---------------------------------------------------------------------------
def _weight_pack_kernel(per_blk, nblk, cin, ntaps=NTAPS):
    def kernel(w_ref, o_ref):
        for blk in range(nblk):
            acc = None
            for u in range(per_blk):
                t = blk * per_blk + u
                if t >= ntaps:
                    break
                w = w_ref[t]                              # (Cout, blk_w) f32
                if u:
                    w = pltpu.roll(w, u * cin, axis=1)    # same primitive/shift as kernel
                acc = w if acc is None else acc + w
            o_ref[blk] = acc
    return kernel


def _dense_pack_weights(w_taps_t, cin, plan):
    """(9, Cout, Cpad) per-tap transposed weights -> (nblk, blk_w, Cout) bf16."""
    per_blk, blk_w, nblk = plan
    ntaps, cout, _ = w_taps_t.shape
    if per_blk == 1:
        dense_t = w_taps_t                                # already one tap per block
    else:
        dense_t = pl.pallas_call(
            _weight_pack_kernel(per_blk, nblk, cin, ntaps),
            out_shape=jax.ShapeDtypeStruct((nblk, cout, blk_w), jnp.float32),
        )(w_taps_t)
    return jnp.transpose(dense_t, (0, 2, 1)).astype(jnp.bfloat16)


# ---------------------------------------------------------------------------
# Fused BasicBlock kernel
# ---------------------------------------------------------------------------
def _make_block_kernel(*, B, Ho, Wo, Hph, Cp, Cq, W2p, stride, has_down,
                       cin1, plan1, cin2, plan2):
    M = B * Ho * Wo

    def tap_origin(i, j):
        # tap (i, j) at stride s on the phase-split padded input is a contiguous
        # (Ho, Wo) window of phase (i % s, j % s) starting at (i//s, j//s).
        p = (i % stride) * stride + (j % stride)
        return p * Hph + i // stride, j // stride

    def dense_conv(tap_fn, w_ref, cin, plan):
        """3x3 conv as nblk dense-K MXU matmuls with an f32 accumulator."""
        per_blk, _, nblk = plan
        acc = None
        for blk in range(nblk):
            lhs = None
            for u in range(per_blk):
                t = blk * per_blk + u
                if t >= NTAPS:
                    break
                tap = tap_fn(t)                           # (M, blk_w) f32, zeros in pad lanes
                if u:
                    tap = pltpu.roll(tap, u * cin, axis=1)  # lane-pack tap u into the block
                lhs = tap if lhs is None else lhs + tap
            part = jnp.dot(lhs.astype(jnp.bfloat16), w_ref[blk],
                           preferred_element_type=jnp.float32)
            acc = part if acc is None else acc + part
        return acc

    def kernel(*refs):
        if has_down:
            (x_ref, w1_ref, b1_ref, w2_ref, b2_ref, bd_ref, o_ref, mid_ref) = refs
        else:
            (x_ref, w1_ref, b1_ref, w2_ref, b2_ref, o_ref, mid_ref) = refs

        def x_tap(t):                                     # (M, Cp) f32
            i, j = divmod(t, 3)
            r0, c0 = tap_origin(i, j)
            return x_ref[:, r0:r0 + Ho, c0:c0 + Wo, :].reshape(M, Cp)

        # ---- conv1 (3x3, stride s) + folded BN1, fused with the 1x1 downsample
        z = dense_conv(x_tap, w1_ref, cin1, plan1)        # (M, Cq) or (M, 2*Cq)
        h = jnp.maximum(z[:, :Cq] + b1_ref[...], 0.0)     # ReLU

        if has_down:
            idv = z[:, Cq:] + bd_ref[...]                 # downsample output columns
        else:
            idv = x_tap(4)                                # identity path, Cp == Cq

        # ---- intermediate activation in VMEM with a 1-px zero halo for conv2.
        # Only the halo ring is (re)written; the interior is stored exactly once.
        # (Done every step -- not just at program_id==0 -- so it stays correct if
        # the batch grid axis is split across TensorCores.)
        zrow = jnp.zeros((B, 1, W2p, Cq), jnp.float32)
        mid_ref[:, 0:1, :, :] = zrow
        mid_ref[:, Ho + 1:Ho + 2, :, :] = zrow
        mid_ref[:, 1:Ho + 1, 0:1, :] = jnp.zeros((B, Ho, 1, Cq), jnp.float32)
        mid_ref[:, 1:Ho + 1, Wo + 1:W2p, :] = jnp.zeros((B, Ho, W2p - Wo - 1, Cq),
                                                        jnp.float32)
        mid_ref[:, 1:Ho + 1, 1:Wo + 1, :] = h.reshape(B, Ho, Wo, Cq)

        def m_tap(t):                                     # (M, Cq) f32
            i, j = divmod(t, 3)
            return mid_ref[:, i:i + Ho, j:j + Wo, :].reshape(M, Cq)

        # ---- conv2 (3x3, stride 1) + folded BN2
        y = dense_conv(m_tap, w2_ref, cin2, plan2) + b2_ref[...]

        out = jnp.maximum(y + idv, 0.0)                   # residual add + final ReLU
        o_ref[...] = out.reshape(B, Ho, Wo, Cq).astype(o_ref.dtype)

    return kernel


def _pick_batch_block(n, m_per_image, target=512):
    """Largest divisor of n whose batch block keeps M = B*Ho*Wo near `target`."""
    want = max(1, -(-target // m_per_image))
    best = 1
    for d in range(1, n + 1):
        if n % d == 0 and d <= want:
            best = d
    return best


def basic_block_forward(packed, x_nchw, *, chain_format=False):
    """BasicBlock forward (eval-mode BN).  Default: NCHW f32 in / NCHW f32 out.

    chain_format=True returns padded NHWC bf16 (no channel slice / transpose),
    the cheap format for chaining blocks back-to-back.
    """
    stride = packed["stride"]
    inplanes, planes = packed["inplanes"], packed["planes"]
    Cp, Cq = packed["Cp"], packed["Cq"]
    has_down = "bd" in packed

    N, Cin, H, W = x_nchw.shape
    assert Cin == inplanes
    Ho = (H + 2 - 3) // stride + 1
    Wo = (W + 2 - 3) // stride + 1
    Hph = 2 // stride + Ho                 # per-phase extent so every tap window fits
    Wph = 2 // stride + Wo
    nph = stride * stride
    W2p = _round_up(Wo + 2, SUBLANE)       # sublane-aligned mid-scratch width

    # NCHW -> NHWC, conv padding (=1), channel pad to the 128-lane tile, and
    # bottom/right pad so the stride-phase decomposition is rectangular.
    x = jnp.transpose(x_nchw, (0, 2, 3, 1)).astype(jnp.float32)
    x = jnp.pad(x, ((0, 0),
                    (1, stride * Hph - H - 1),
                    (1, stride * Wph - W - 1),
                    (0, Cp - Cin)))
    # Space-to-phase split so every strided 3x3 tap is a contiguous static window.
    # TODO(synk): for stride=2 this costs one extra HBM round trip of the input;
    # it could move in-kernel with strided pl.ds reads.
    phases = [x[:, a::stride, b::stride, :]
              for a in range(stride) for b in range(stride)]
    xph = jnp.concatenate(phases, axis=1)          # (N, nph*Hph, Wph, Cp)

    B_blk = _pick_batch_block(N, Ho * Wo)
    kernel = _make_block_kernel(B=B_blk, Ho=Ho, Wo=Wo, Hph=Hph, Cp=Cp, Cq=Cq,
                                W2p=W2p, stride=stride, has_down=has_down,
                                cin1=inplanes, plan1=packed["plan1"],
                                cin2=planes, plan2=packed["plan2"])

    def resident(shape):                           # whole array, VMEM-resident
        return pl.BlockSpec(shape, lambda n, _nd=len(shape): (0,) * _nd)

    inputs = [xph, packed["w1"], packed["b1"], packed["w2"], packed["b2"]]
    if has_down:
        inputs.append(packed["bd"])
    in_specs = [pl.BlockSpec((B_blk, nph * Hph, Wph, Cp), lambda n: (n, 0, 0, 0))]
    in_specs += [resident(a.shape) for a in inputs[1:]]

    out_dtype = jnp.bfloat16 if chain_format else jnp.float32
    out = pl.pallas_call(
        kernel,
        out_shape=jax.ShapeDtypeStruct((N, Ho, Wo, Cq), out_dtype),
        grid_spec=pltpu.PrefetchScalarGridSpec(
            num_scalar_prefetch=0,
            grid=(N // B_blk,),
            in_specs=in_specs,
            out_specs=pl.BlockSpec((B_blk, Ho, Wo, Cq), lambda n: (n, 0, 0, 0)),
            scratch_shapes=[pltpu.VMEM((B_blk, Ho + 2, W2p, Cq), jnp.float32)]),
        compiler_params=pltpu.CompilerParams(
            dimension_semantics=("parallel",)),    # megacore split over batch blocks
    )(*inputs)

    if chain_format:
        return out                                 # padded NHWC bf16
    out = out[:, :, :, :planes]                    # drop lane padding
    return jnp.transpose(out, (0, 3, 1, 2))        # back to NCHW f32


# ---------------------------------------------------------------------------
# Parameter construction (mirrors the PyTorch module) and one-time folding/packing
# ---------------------------------------------------------------------------
def _kaiming_conv(key, cout, cin, kh, kw):
    fan_out = cout * kh * kw
    std = (2.0 / fan_out) ** 0.5
    return std * jax.random.normal(key, (cout, cin, kh, kw), jnp.float32)


def _rand_bn(key, c):
    k1, k2, k3, k4 = jax.random.split(key, 4)
    return (jax.random.uniform(k1, (c,), jnp.float32, 0.5, 1.5),   # gamma
            0.1 * jax.random.normal(k2, (c,), jnp.float32),        # beta
            0.1 * jax.random.normal(k3, (c,), jnp.float32),        # running_mean
            jax.random.uniform(k4, (c,), jnp.float32, 0.5, 1.5))   # running_var


def init_basic_block_params(key, inplanes, planes, stride):
    ks = jax.random.split(key, 6)
    raw = {
        "conv1_w": _kaiming_conv(ks[0], planes, inplanes, 3, 3),
        "bn1": _rand_bn(ks[1], planes),
        "conv2_w": _kaiming_conv(ks[2], planes, planes, 3, 3),
        "bn2": _rand_bn(ks[3], planes),
    }
    if stride != 1 or inplanes != planes:          # downsample = conv1x1(stride) + BN
        raw["down_w"] = _kaiming_conv(ks[4], planes, inplanes, 1, 1)
        raw["down_bn"] = _rand_bn(ks[5], planes)
    return raw


def _fold_bn(conv_w, bn):
    gamma, beta, mean, var = bn
    scale = gamma / jnp.sqrt(var + BN_EPS)
    return conv_w * scale[:, None, None, None], beta - mean * scale


def _per_tap_t(w, cout_pad, cin_pad):
    """(cout, cin, 3, 3) -> (9, cout_pad, cin_pad) per-tap transposed matrices."""
    cout, cin, kh, kw = w.shape
    t = jnp.transpose(w, (2, 3, 0, 1)).reshape(kh * kw, cout, cin)
    return jnp.pad(t, ((0, 0), (0, cout_pad - cout), (0, cin_pad - cin)))


def _pack_bias(b, cq):
    return jnp.pad(b, (0, cq - b.shape[0])).reshape(1, cq).astype(jnp.float32)


def pack_basic_block_params(raw, inplanes, planes, stride):
    cp, cq = _round_up(inplanes, LANE), _round_up(planes, LANE)
    has_down = "down_w" in raw
    plan1, plan2 = _k_plan(inplanes), _k_plan(planes)

    w1, b1 = _fold_bn(raw["conv1_w"], raw["bn1"])
    w2, b2 = _fold_bn(raw["conv2_w"], raw["bn2"])

    w1t = _per_tap_t(w1, cq, cp)                        # (9, Cq, Cp)
    if has_down:
        # Fuse the 1x1 downsample (consumes the centre tap) into conv1's matmul
        # as extra output columns [Cq, 2Cq).
        wd, bd = _fold_bn(raw["down_w"], raw["down_bn"])
        dmat = jnp.pad(wd[:, :, 0, 0], ((0, cq - planes), (0, cp - inplanes)))
        dstack = jnp.zeros((NTAPS, cq, cp), jnp.float32).at[4].set(dmat)
        w1t = jnp.concatenate([w1t, dstack], axis=1)    # (9, 2*Cq, Cp)

    packed = {
        "stride": int(stride), "inplanes": int(inplanes), "planes": int(planes),
        "Cp": int(cp), "Cq": int(cq), "plan1": plan1, "plan2": plan2,
        "w1": _dense_pack_weights(w1t, inplanes, plan1),
        "b1": _pack_bias(b1, cq),
        "w2": _dense_pack_weights(_per_tap_t(w2, cq, cq), planes, plan2),
        "b2": _pack_bias(b2, cq),
    }
    if has_down:
        packed["bd"] = _pack_bias(bd, cq)
    return packed


# ---------------------------------------------------------------------------
# Pure-JAX (XLA) f32 reference of the PyTorch BasicBlock forward, for verification
# ---------------------------------------------------------------------------
def basic_block_reference(raw, x_nchw, stride):
    def conv(x, w, s, pad):
        return jax.lax.conv_general_dilated(
            x, w, window_strides=(s, s), padding=[(pad, pad), (pad, pad)],
            dimension_numbers=("NCHW", "OIHW", "NCHW"))

    def bn(x, p):
        gamma, beta, mean, var = p
        scale = gamma / jnp.sqrt(var + BN_EPS)
        return (x * scale[None, :, None, None]
                + (beta - mean * scale)[None, :, None, None])

    out = jax.nn.relu(bn(conv(x_nchw, raw["conv1_w"], stride, 1), raw["bn1"]))
    out = bn(conv(out, raw["conv2_w"], 1, 1), raw["bn2"])
    if "down_w" in raw:
        identity = bn(conv(x_nchw, raw["down_w"], stride, 0), raw["down_bn"])
    else:
        identity = x_nchw
    return jax.nn.relu(out + identity)


if __name__ == "__main__":
    key = jax.random.PRNGKey(0)
    k_p, k_x = jax.random.split(key)
    N, H, W = 2, 16, 16

    # (a) stride-2 BasicBlock with 1x1 downsample: 16 -> 32 channels, 16x16 -> 8x8
    inplanes, planes, stride = 16, 32, 2
    raw = init_basic_block_params(k_p, inplanes, planes, stride)
    packed = pack_basic_block_params(raw, inplanes, planes, stride)
    x = jax.random.normal(k_x, (N, inplanes, H, W), jnp.float32)

    fwd = jax.jit(functools.partial(basic_block_forward, packed))
    out = fwd(x)
    jax.block_until_ready(out)
    assert out.shape == (N, planes, H // stride, W // stride), out.shape
    ref = basic_block_reference(raw, x, stride)
    err = float(jnp.max(jnp.abs(out - ref)))
    tol = 0.05 * float(jnp.max(jnp.abs(ref))) + 0.05      # bf16-MXU tolerance
    assert err < tol, (err, tol)

    # (b) stride-1 identity BasicBlock: 16 -> 16 channels, no downsample
    raw_b = init_basic_block_params(jax.random.fold_in(k_p, 1), inplanes, inplanes, 1)
    packed_b = pack_basic_block_params(raw_b, inplanes, inplanes, 1)
    fwd_b = jax.jit(functools.partial(basic_block_forward, packed_b))
    out_b = fwd_b(x)
    jax.block_until_ready(out_b)
    assert out_b.shape == (N, inplanes, H, W), out_b.shape
    ref_b = basic_block_reference(raw_b, x, 1)
    err_b = float(jnp.max(jnp.abs(out_b - ref_b)))
    tol_b = 0.05 * float(jnp.max(jnp.abs(ref_b))) + 0.05
    assert err_b < tol_b, (err_b, tol_b)

    print("KERNEL_OK")
</pallas_src>

<mosaic_0001>
module attributes {stable_mosaic.version = 11 : i64} {
  func.func @kernel(%arg0: memref<9x256x128xf32, #tpu.memory_space<vmem>>, %arg1: memref<2x256x128xf32, #tpu.memory_space<vmem>>) attributes {dimension_semantics = [], scalar_prefetch = 0 : i64, scratch_operands = 0 : i64, tpu.core_type = #tpu.core_type<tc>} {
    %c0 = arith.constant 0 : index
    %c0_0 = arith.constant 0 : index
    %c0_1 = arith.constant 0 : index
    %0 = vector.load %arg0[%c0, %c0_0, %c0_1] : memref<9x256x128xf32, #tpu.memory_space<vmem>>, vector<1x256x128xf32>
    %1 = vector.shape_cast %0 : vector<1x256x128xf32> to vector<256x128xf32>
    %c1 = arith.constant 1 : index
    %c0_2 = arith.constant 0 : index
    %c0_3 = arith.constant 0 : index
    %2 = vector.load %arg0[%c1, %c0_2, %c0_3] : memref<9x256x128xf32, #tpu.memory_space<vmem>>, vector<1x256x128xf32>
    %3 = vector.shape_cast %2 : vector<1x256x128xf32> to vector<256x128xf32>
    %c16_i32 = arith.constant 16 : i32
    %4 = tpu.dynamic_rotate %3 by %c16_i32 dim 1 : vector<256x128xf32>, i32 -> vector<256x128xf32>
    %5 = arith.addf %1, %4 : vector<256x128xf32>
    %c2 = arith.constant 2 : index
    %c0_4 = arith.constant 0 : index
    %c0_5 = arith.constant 0 : index
    %6 = vector.load %arg0[%c2, %c0_4, %c0_5] : memref<9x256x128xf32, #tpu.memory_space<vmem>>, vector<1x256x128xf32>
    %7 = vector.shape_cast %6 : vector<1x256x128xf32> to vector<256x128xf32>
    %c32_i32 = arith.constant 32 : i32
    %8 = tpu.dynamic_rotate %7 by %c32_i32 dim 1 : vector<256x128xf32>, i32 -> vector<256x128xf32>
    %9 = arith.addf %5, %8 : vector<256x128xf32>
    %c3 = arith.constant 3 : index
    %c0_6 = arith.constant 0 : index
    %c0_7 = arith.constant 0 : index
    %10 = vector.load %arg0[%c3, %c0_6, %c0_7] : memref<9x256x128xf32, #tpu.memory_space<vmem>>, vector<1x256x128xf32>
    %11 = vector.shape_cast %10 : vector<1x256x128xf32> to vector<256x128xf32>
    %c48_i32 = arith.constant 48 : i32
    %12 = tpu.dynamic_rotate %11 by %c48_i32 dim 1 : vector<256x128xf32>, i32 -> vector<256x128xf32>
    %13 = arith.addf %9, %12 : vector<256x128xf32>
    %c4 = arith.constant 4 : index
    %c0_8 = arith.constant 0 : index
    %c0_9 = arith.constant 0 : index
    %14 = vector.load %arg0[%c4, %c0_8, %c0_9] : memref<9x256x128xf32, #tpu.memory_space<vmem>>, vector<1x256x128xf32>
    %15 = vector.shape_cast %14 : vector<1x256x128xf32> to vector<256x128xf32>
    %c64_i32 = arith.constant 64 : i32
    %16 = tpu.dynamic_rotate %15 by %c64_i32 dim 1 : vector<256x128xf32>, i32 -> vector<256x128xf32>
    %17 = arith.addf %13, %16 : vector<256x128xf32>
    %c5 = arith.constant 5 : index
    %c0_10 = arith.constant 0 : index
    %c0_11 = arith.constant 0 : index
    %18 = vector.load %arg0[%c5, %c0_10, %c0_11] : memref<9x256x128xf32, #tpu.memory_space<vmem>>, vector<1x256x128xf32>
    %19 = vector.shape_cast %18 : vector<1x256x128xf32> to vector<256x128xf32>
    %c80_i32 = arith.constant 80 : i32
    %20 = tpu.dynamic_rotate %19 by %c80_i32 dim 1 : vector<256x128xf32>, i32 -> vector<256x128xf32>
    %21 = arith.addf %17, %20 : vector<256x128xf32>
    %c6 = arith.constant 6 : index
    %c0_12 = arith.constant 0 : index
    %c0_13 = arith.constant 0 : index
    %22 = vector.load %arg0[%c6, %c0_12, %c0_13] : memref<9x256x128xf32, #tpu.memory_space<vmem>>, vector<1x256x128xf32>
    %23 = vector.shape_cast %22 : vector<1x256x128xf32> to vector<256x128xf32>
    %c96_i32 = arith.constant 96 : i32
    %24 = tpu.dynamic_rotate %23 by %c96_i32 dim 1 : vector<256x128xf32>, i32 -> vector<256x128xf32>
    %25 = arith.addf %21, %24 : vector<256x128xf32>
    %c7 = arith.constant 7 : index
    %c0_14 = arith.constant 0 : index
    %c0_15 = arith.constant 0 : index
    %26 = vector.load %arg0[%c7, %c0_14, %c0_15] : memref<9x256x128xf32, #tpu.memory_space<vmem>>, vector<1x256x128xf32>
    %27 = vector.shape_cast %26 : vector<1x256x128xf32> to vector<256x128xf32>
    %c112_i32 = arith.constant 112 : i32
    %28 = tpu.dynamic_rotate %27 by %c112_i32 dim 1 : vector<256x128xf32>, i32 -> vector<256x128xf32>
    %29 = arith.addf %25, %28 : vector<256x128xf32>
    %c0_16 = arith.constant 0 : index
    %c0_17 = arith.constant 0 : index
    %c0_18 = arith.constant 0 : index
    %30 = vector.load %arg1[%c0_16, %c0_17, %c0_18] : memref<2x256x128xf32, #tpu.memory_space<vmem>>, vector<1x256x128xf32>
    %31 = vector.shape_cast %30 : vector<1x256x128xf32> to vector<256x128xf32>
    %32 = vector.shape_cast %29 : vector<256x128xf32> to vector<1x256x128xf32>
    tpu.vector_store %arg1[%c0_16, %c0_17, %c0_18], %32 {strides = array<i32>} : memref<2x256x128xf32, #tpu.memory_space<vmem>>, vector<1x256x128xf32>,
    %c8 = arith.constant 8 : index
    %c0_19 = arith.constant 0 : index
    %c0_20 = arith.constant 0 : index
    %33 = vector.load %arg0[%c8, %c0_19, %c0_20] : memref<9x256x128xf32, #tpu.memory_space<vmem>>, vector<1x256x128xf32>
    %34 = vector.shape_cast %33 : vector<1x256x128xf32> to vector<256x128xf32>
    %c1_21 = arith.constant 1 : index
    %c0_22 = arith.constant 0 : index
    %c0_23 = arith.constant 0 : index
    %35 = vector.load %arg1[%c1_21, %c0_22, %c0_23] : memref<2x256x128xf32, #tpu.memory_space<vmem>>, vector<1x256x128xf32>
    %36 = vector.shape_cast %35 : vector<1x256x128xf32> to vector<256x128xf32>
    %37 = vector.shape_cast %34 : vector<256x128xf32> to vector<1x256x128xf32>
    tpu.vector_store %arg1[%c1_21, %c0_22, %c0_23], %37 {strides = array<i32>} : memref<2x256x128xf32, #tpu.memory_space<vmem>>, vector<1x256x128xf32>,
    return
  }
}

</mosaic_0001>

<bundles_post_ra>
// kernel: tpu_custom_call.1
= control target key start
LH: loop header
LB: loop body
LE: loop exit
PB: predicated region body
PF: predicated region fallthrough
CT: control target
= control target key end

     0   :  { %6 = vsyncpa [#allocation3], 0  ;;  %s1983_s0 = inlined_call_operand.hbm [shape: f32[9,256,128], index: 0, kind: input, shape index: {}]   ;;  %s1984_s1 = inlined_call_operand.hbm [shape: f32[2,256,128], index: 1, kind: output, shape index: {}]  }
   0x1   :  { %7 = vsyncpa [#allocation4], 0  ;;  %s1132_s6 = smov [#allocation2]   ;;  %s1084_s10 = scalar_lea.hbm %s1983_s0, 36864 }
   0x2   :  { %s13_s7 = sshll.u32 %s1132_s6, 4  ;;  %p1085_p0 = scmp.ne.s32.totalorder %s1983_s0, %s1084_s10  ;;  %s14_s7 = int_to_ptr.vmem [resolvable:$true] %s13_s7 }
   0x3   :  { %p1088_p1 = scmp.lt.u32.totalorder %s1084_s10, %s1983_s0 }
   0x5   :  { %p1090_p2 = pnand %p1088_p1, %p1085_p0 }
   0x7   :  { %1093 = shalt.err (!%p1090_p2)
}
   0x8   :  { %s1094_s15 = scalar_lea.vmem %s14_s7, 36864  ;;  %p1099_p4 = scmp.lt.s32.totalorder %s14_s7, %s14_s7 }
   0x9   :  { %p1095_p3 = scmp.ne.s32.totalorder %s14_s7, %s1094_s15  ;;  %p1100_p5 = scmp.lt.s32.totalorder %s1094_s15, %s1094_s15 }
   0xb   :  { %p1101_p6 = por %p1100_p5, %p1099_p4 }
   0xd   :  { %p1102_p7 = pnand %p1101_p6, %p1095_p3 }
   0xf   :  { %1105 = shalt.err (!%p1102_p7)
}
  0x10   :  { %s1133_s16 = smov 128   ;;  %s1134_s17 = smov 8  }
  0x11   :  { %19 = dma.hbm_to_vmem [thread:$0]  %s1983_s0, 36864, %s14_s7, [#allocation3], %s1133_s16, %s1133_s16, %s1134_s17  }
  0x12   :  { %1128 = dma.done.wait [#allocation3], 36864  }
  0x13   :  { %1129 = vsyncadd [#allocation3], 4294930432  ;;  %v58_v0 = vld [vmem:[#allocation2 + $0x110] sm:$0xff]  ;;  %v56_v1 = vld [vmem:[#allocation2 + $0x100] sm:$0xff]  ;;  %s1135_s20 = smov 16   ;;  %s1136_s0 = smov 32  }
  0x14   :  { %92 = vrot.lane.b32.xlu1 %v58_v0, %s1135_s20  ;;  %88 = vrot.lane.b32.xlu0 %v56_v1, %s1135_s20  ;;  %v59_v2 = vld [vmem:[#allocation2 + $0x118] sm:$0xff]  ;;  %v57_v3 = vld [vmem:[#allocation2 + $0x108] sm:$0xff]  ;;  %v60_v5 = vld [vmem:[#allocation2 + $0x120] sm:$0xff]  ;;  %s1137_s21 = smov 48   ;;  %s1138_s22 = smov 64  }
  0x15   :  { %v61_v4 = vld [vmem:[#allocation2 + $0x128] sm:$0xff]  ;;  %v63_v6 = vld [vmem:[#allocation2 + $0x138] sm:$0xff]  ;;  %v62_v7 = vld [vmem:[#allocation2 + $0x130] sm:$0xff]  ;;  %s1139_s23 = smov 80   ;;  %s1140_s24 = smov 96  }
  0x16   :  { %v65_v8 = vld [vmem:[#allocation2 + $0x148] sm:$0xff]  ;;  %v64_v9 = vld [vmem:[#allocation2 + $0x140] sm:$0xff]  ;;  %v67_v10 = vld [vmem:[#allocation2 + $0x158] sm:$0xff]  ;;  %s1141_s25 = smov 112   ;;  %s1142_s26 = smov [#allocation5]  }
  0x17   :  { %v66_v11 = vld [vmem:[#allocation2 + $0x150] sm:$0xff]  ;;  %v69_v12 = vld [vmem:[#allocation2 + $0x168] sm:$0xff]  ;;  %v68_v13 = vld [vmem:[#allocation2 + $0x160] sm:$0xff]  ;;  %s1061_s27 = sshll.u32 %s1142_s26, 4  ;;  %s1062_s27 = int_to_ptr.vmem [resolvable:$true] %s1061_s27 }
  0x18   :  { %94 = vrot.lane.b32.xlu1 %v59_v2, %s1135_s20  ;;  %90 = vrot.lane.b32.xlu0 %v57_v3, %s1135_s20  ;;  %v71_v14 = vld [vmem:[#allocation2 + $0x178] sm:$0xff]  ;;  %v70_v15 = vld [vmem:[#allocation2 + $0x170] sm:$0xff]  ;;  %v73_v16 = vld [vmem:[#allocation2 + $0x188] sm:$0xff]  ;;  %s1106_s28 = scalar_lea.vmem %s1062_s27, 8192  ;;  %p1111_p9 = scmp.lt.s32.totalorder %s1062_s27, %s1062_s27 }
  0x19   :  { %v72_v17 = vld [vmem:[#allocation2 + $0x180] sm:$0xff]  ;;  %v75_v18 = vld [vmem:[#allocation2 + $0x198] sm:$0xff]  ;;  %v74_v19 = vld [vmem:[#allocation2 + $0x190] sm:$0xff]  ;;  %p1107_p8 = scmp.ne.s32.totalorder %s1062_s27, %s1106_s28  ;;  %p1112_p10 = scmp.lt.s32.totalorder %s1106_s28, %s1106_s28 }
  0x1a   :  { %v77_v20 = vld [vmem:[#allocation2 + $0x1a8] sm:$0xff]  ;;  %v76_v21 = vld [vmem:[#allocation2 + $0x1a0] sm:$0xff]  ;;  %v79_v22 = vld [vmem:[#allocation2 + $0x1b8] sm:$0xff] }
  0x1b   :  { %v78_v23 = vld [vmem:[#allocation2 + $0x1b0] sm:$0xff]  ;;  %v81_v24 = vld [vmem:[#allocation2 + $0x1c8] sm:$0xff]  ;;  %v80_v25 = vld [vmem:[#allocation2 + $0x1c0] sm:$0xff]  ;;  %p1113_p11 = por %p1112_p10, %p1111_p9 }
  0x1c   :  { %98 = vrot.lane.b32.xlu1 %v61_v4, %s1135_s20  ;;  %96 = vrot.lane.b32.xlu0 %v60_v5, %s1135_s20  ;;  %v83_v26 = vld [vmem:[#allocation2 + $0x1d8] sm:$0xff]  ;;  %v82_v27 = vld [vmem:[#allocation2 + $0x1d0] sm:$0xff]  ;;  %v85_v28 = vld [vmem:[#allocation2 + $0x1e8] sm:$0xff] }
  0x1d   :  { %v84_v29 = vld [vmem:[#allocation2 + $0x1e0] sm:$0xff]  ;;  %v87_v30 = vld [vmem:[#allocation2 + $0x1f8] sm:$0xff]  ;;  %v86_v31 = vld [vmem:[#allocation2 + $0x1f0] sm:$0xff]  ;;  %p1114_p12 = pnand %p1113_p11, %p1107_p8 }
  0x1e   :  { %v186_v32 = vld [vmem:[#allocation2 + $0x208] sm:$0xff]  ;;  %v185_v33 = vld [vmem:[#allocation2 + $0x200] sm:$0xff]  ;;  %v188_v34 = vld [vmem:[#allocation2 + $0x218] sm:$0xff] }
  0x1f   :  { %v187_v35 = vld [vmem:[#allocation2 + $0x210] sm:$0xff]  ;;  %v190_v36 = vld [vmem:[#allocation2 + $0x228] sm:$0xff]  ;;  %v189_v37 = vld [vmem:[#allocation2 + $0x220] sm:$0xff] }
  0x20   :  { %102 = vrot.lane.b32.xlu1 %v63_v6, %s1135_s20  ;;  %100 = vrot.lane.b32.xlu0 %v62_v7, %s1135_s20  ;;  %v192_v38 = vld [vmem:[#allocation2 + $0x238] sm:$0xff]  ;;  %v191_v39 = vld [vmem:[#allocation2 + $0x230] sm:$0xff]  ;;  %v194_v40 = vld [vmem:[#allocation2 + $0x248] sm:$0xff] }
  0x21   :  { %v193_v41 = vld [vmem:[#allocation2 + $0x240] sm:$0xff]  ;;  %v196_v42 = vld [vmem:[#allocation2 + $0x258] sm:$0xff]  ;;  %v195_v43 = vld [vmem:[#allocation2 + $0x250] sm:$0xff] }
  0x22   :  { %v198_v44 = vld [vmem:[#allocation2 + $0x268] sm:$0xff]  ;;  %v197_v45 = vld [vmem:[#allocation2 + $0x260] sm:$0xff]  ;;  %v200_v46 = vld [vmem:[#allocation2 + $0x278] sm:$0xff] }
  0x23   :  { %v199_v47 = vld [vmem:[#allocation2 + $0x270] sm:$0xff]  ;;  %v202_v48 = vld [vmem:[#allocation2 + $0x288] sm:$0xff]  ;;  %v201_v49 = vld [vmem:[#allocation2 + $0x280] sm:$0xff] }
  0x24   :  { %106 = vrot.lane.b32.xlu1 %v65_v8, %s1135_s20  ;;  %104 = vrot.lane.b32.xlu0 %v64_v9, %s1135_s20  ;;  %v204_v50 = vld [vmem:[#allocation2 + $0x298] sm:$0xff]  ;;  %v203_v51 = vld [vmem:[#allocation2 + $0x290] sm:$0xff]  ;;  %v206_v52 = vld [vmem:[#allocation2 + $0x2a8] sm:$0xff] }
  0x25   :  { %v205_v53 = vld [vmem:[#allocation2 + $0x2a0] sm:$0xff]  ;;  %v208_v54 = vld [vmem:[#allocation2 + $0x2b8] sm:$0xff]  ;;  %v207_v55 = vld [vmem:[#allocation2 + $0x2b0] sm:$0xff] }
  0x26   :  { %v210_v56 = vld [vmem:[#allocation2 + $0x2c8] sm:$0xff]  ;;  %v209_v57 = vld [vmem:[#allocation2 + $0x2c0] sm:$0xff]  ;;  %v212_v58 = vld [vmem:[#allocation2 + $0x2d8] sm:$0xff] }
  0x27   :  { %v211_v59 = vld [vmem:[#allocation2 + $0x2d0] sm:$0xff]  ;;  %v214_v62 = vld [vmem:[#allocation2 + $0x2e8] sm:$0xff]  ;;  %v213_v63 = vld [vmem:[#allocation2 + $0x2e0] sm:$0xff] }
  0x28   :  { %110 = vrot.lane.b32.xlu1 %v67_v10, %s1135_s20  ;;  %108 = vrot.lane.b32.xlu0 %v66_v11, %s1135_s20  ;;  %v216_v2 = vld [vmem:[#allocation2 + $0x2f8] sm:$0xff]  ;;  %v215_v3 = vld [vmem:[#allocation2 + $0x2f0] sm:$0xff]  ;;  %v315_v6 = vld [vmem:[#allocation2 + $0x308] sm:$0xff] }
  0x29   :  { %v314_v7 = vld [vmem:[#allocation2 + $0x300] sm:$0xff]  ;;  %v317_v10 = vld [vmem:[#allocation2 + $0x318] sm:$0xff]  ;;  %v316_v11 = vld [vmem:[#allocation2 + $0x310] sm:$0xff] }
  0x2c   :  { %114 = vrot.lane.b32.xlu1 %v69_v12, %s1135_s20  ;;  %112 = vrot.lane.b32.xlu0 %v68_v13, %s1135_s20 }
  0x30   :  { %118 = vrot.lane.b32.xlu1 %v71_v14, %s1135_s20  ;;  %116 = vrot.lane.b32.xlu0 %v70_v15, %s1135_s20  ;;  %v319_v14 = vld [vmem:[#allocation2 + $0x328] sm:$0xff]  ;;  %v318_v15 = vld [vmem:[#allocation2 + $0x320] sm:$0xff] }
  0x34   :  { %122 = vrot.lane.b32.xlu1 %v73_v16, %s1135_s20  ;;  %120 = vrot.lane.b32.xlu0 %v72_v17, %s1135_s20 }
  0x38   :  { %126 = vrot.lane.b32.xlu1 %v75_v18, %s1135_s20  ;;  %124 = vrot.lane.b32.xlu0 %v74_v19, %s1135_s20  ;;  %v321_v18 = vld [vmem:[#allocation2 + $0x338] sm:$0xff]  ;;  %v320_v19 = vld [vmem:[#allocation2 + $0x330] sm:$0xff] }
  0x3c   :  { %130 = vrot.lane.b32.xlu1 %v77_v20, %s1135_s20  ;;  %128 = vrot.lane.b32.xlu0 %v76_v21, %s1135_s20 }
  0x40   :  { %134 = vrot.lane.b32.xlu1 %v79_v22, %s1135_s20  ;;  %132 = vrot.lane.b32.xlu0 %v78_v23, %s1135_s20  ;;  %v323_v22 = vld [vmem:[#allocation2 + $0x348] sm:$0xff]  ;;  %v322_v23 = vld [vmem:[#allocation2 + $0x340] sm:$0xff] }
  0x44   :  { %138 = vrot.lane.b32.xlu1 %v81_v24, %s1135_s20  ;;  %136 = vrot.lane.b32.xlu0 %v80_v25, %s1135_s20 }
  0x48   :  { %142 = vrot.lane.b32.xlu1 %v83_v26, %s1135_s20  ;;  %140 = vrot.lane.b32.xlu0 %v82_v27, %s1135_s20  ;;  %v325_v26 = vld [vmem:[#allocation2 + $0x358] sm:$0xff]  ;;  %v324_v27 = vld [vmem:[#allocation2 + $0x350] sm:$0xff] }
  0x4c   :  { %146 = vrot.lane.b32.xlu1 %v85_v28, %s1135_s20  ;;  %144 = vrot.lane.b32.xlu0 %v84_v29, %s1135_s20 }
  0x50   :  { %150 = vrot.lane.b32.xlu1 %v87_v30, %s1135_s20  ;;  %148 = vrot.lane.b32.xlu0 %v86_v31, %s1135_s20  ;;  %v327_v30 = vld [vmem:[#allocation2 + $0x368] sm:$0xff]  ;;  %v326_v31 = vld [vmem:[#allocation2 + $0x360] sm:$0xff] }
  0x54   :  { %219 = vrot.lane.b32.xlu1 %v186_v32, %s1136_s0  ;;  %217 = vrot.lane.b32.xlu0 %v185_v33, %s1136_s0 }
  0x58   :  { %223 = vrot.lane.b32.xlu1 %v188_v34, %s1136_s0  ;;  %221 = vrot.lane.b32.xlu0 %v187_v35, %s1136_s0  ;;  %v329_v34 = vld [vmem:[#allocation2 + $0x378] sm:$0xff]  ;;  %v328_v35 = vld [vmem:[#allocation2 + $0x370] sm:$0xff] }
  0x5c   :  { %227 = vrot.lane.b32.xlu1 %v190_v36, %s1136_s0  ;;  %225 = vrot.lane.b32.xlu0 %v189_v37, %s1136_s0 }
  0x60   :  { %231 = vrot.lane.b32.xlu1 %v192_v38, %s1136_s0  ;;  %229 = vrot.lane.b32.xlu0 %v191_v39, %s1136_s0  ;;  %v331_v38 = vld [vmem:[#allocation2 + $0x388] sm:$0xff]  ;;  %v330_v39 = vld [vmem:[#allocation2 + $0x380] sm:$0xff] }
  0x64   :  { %235 = vrot.lane.b32.xlu1 %v194_v40, %s1136_s0  ;;  %233 = vrot.lane.b32.xlu0 %v193_v41, %s1136_s0 }
  0x68   :  { %239 = vrot.lane.b32.xlu1 %v196_v42, %s1136_s0  ;;  %237 = vrot.lane.b32.xlu0 %v195_v43, %s1136_s0  ;;  %v333_v42 = vld [vmem:[#allocation2 + $0x398] sm:$0xff]  ;;  %v332_v43 = vld [vmem:[#allocation2 + $0x390] sm:$0xff] }
  0x6c   :  { %243 = vrot.lane.b32.xlu1 %v198_v44, %s1136_s0  ;;  %241 = vrot.lane.b32.xlu0 %v197_v45, %s1136_s0 }
  0x70   :  { %247 = vrot.lane.b32.xlu1 %v200_v46, %s1136_s0  ;;  %245 = vrot.lane.b32.xlu0 %v199_v47, %s1136_s0  ;;  %v335_v46 = vld [vmem:[#allocation2 + $0x3a8] sm:$0xff]  ;;  %v334_v47 = vld [vmem:[#allocation2 + $0x3a0] sm:$0xff] }
  0x74   :  { %251 = vrot.lane.b32.xlu1 %v202_v48, %s1136_s0  ;;  %249 = vrot.lane.b32.xlu0 %v201_v49, %s1136_s0 }
  0x78   :  { %255 = vrot.lane.b32.xlu1 %v204_v50, %s1136_s0  ;;  %253 = vrot.lane.b32.xlu0 %v203_v51, %s1136_s0  ;;  %v337_v50 = vld [vmem:[#allocation2 + $0x3b8] sm:$0xff]  ;;  %v336_v51 = vld [vmem:[#allocation2 + $0x3b0] sm:$0xff] }
  0x7c   :  { %259 = vrot.lane.b32.xlu1 %v206_v52, %s1136_s0  ;;  %257 = vrot.lane.b32.xlu0 %v205_v53, %s1136_s0 }
  0x80   :  { %263 = vrot.lane.b32.xlu1 %v208_v54, %s1136_s0  ;;  %261 = vrot.lane.b32.xlu0 %v207_v55, %s1136_s0  ;;  %v339_v54 = vld [vmem:[#allocation2 + $0x3c8] sm:$0xff]  ;;  %v338_v55 = vld [vmem:[#allocation2 + $0x3c0] sm:$0xff] }
  0x84   :  { %267 = vrot.lane.b32.xlu1 %v210_v56, %s1136_s0  ;;  %265 = vrot.lane.b32.xlu0 %v209_v57, %s1136_s0 }
  0x86   :  { %v1226_v60 = vpop.permute.xlu1 %92  ;;  %v1228_v61 = vpop.permute.xlu0 %88 }
  0x88   :  { %271 = vrot.lane.b32.xlu1 %v212_v58, %s1136_s0  ;;  %269 = vrot.lane.b32.xlu0 %v211_v59, %s1136_s0  ;;  %v341_v58 = vld [vmem:[#allocation2 + $0x3d8] sm:$0xff]  ;;  %v340_v59 = vld [vmem:[#allocation2 + $0x3d0] sm:$0xff] }
  0x8a   :  { %v1232_v0 = vpop.permute.xlu1 %94  ;;  %v1234_v1 = vpop.permute.xlu0 %90 }
  0x8c   :  { %275 = vrot.lane.b32.xlu1 %v214_v62, %s1136_s0  ;;  %273 = vrot.lane.b32.xlu0 %v213_v63, %s1136_s0 }
  0x8e   :  { %v1238_v4 = vpop.permute.xlu1 %98  ;;  %v1240_v5 = vpop.permute.xlu0 %96 }
  0x90   :  { %279 = vrot.lane.b32.xlu1 %v216_v2, %s1136_s0  ;;  %277 = vrot.lane.b32.xlu0 %v215_v3, %s1136_s0  ;;  %v343_v2 = vld [vmem:[#allocation2 + $0x3e8] sm:$0xff]  ;;  %v342_v3 = vld [vmem:[#allocation2 + $0x3e0] sm:$0xff] }
  0x92   :  { %v1244_v8 = vpop.permute.xlu1 %102  ;;  %v1246_v9 = vpop.permute.xlu0 %100 }
  0x94   :  { %348 = vrot.lane.b32.xlu1 %v315_v6, %s1137_s21  ;;  %346 = vrot.lane.b32.xlu0 %v314_v7, %s1137_s21 }
  0x96   :  { %v1250_v12 = vpop.permute.xlu1 %106  ;;  %v1252_v13 = vpop.permute.xlu0 %104 }
  0x98   :  { %352 = vrot.lane.b32.xlu1 %v317_v10, %s1137_s21  ;;  %350 = vrot.lane.b32.xlu0 %v316_v11, %s1137_s21  ;;  %v345_v10 = vld [vmem:[#allocation2 + $0x3f8] sm:$0xff]  ;;  %v344_v11 = vld [vmem:[#allocation2 + $0x3f0] sm:$0xff] }
  0x9a   :  { %v1256_v16 = vpop.permute.xlu1 %110  ;;  %v1258_v17 = vpop.permute.xlu0 %108 }
  0x9b   :  { %1985 = vst [vmem:[#allocation8_spill] sm:$0xff] %v1256_v16  ;;  %1986 = vst [vmem:[#allocation9_spill] sm:$0xff] %v1258_v17 }
  0x9c   :  { %356 = vrot.lane.b32.xlu1 %v319_v14, %s1137_s21  ;;  %354 = vrot.lane.b32.xlu0 %v318_v15, %s1137_s21 }
  0x9e   :  { %v1262_v20 = vpop.permute.xlu1 %114  ;;  %v1264_v21 = vpop.permute.xlu0 %112 }
  0x9f   :  { %1987 = vst [vmem:[#allocation10_spill] sm:$0xff] %v1262_v20  ;;  %1988 = vst [vmem:[#allocation11_spill] sm:$0xff] %v1264_v21 }
  0xa0   :  { %360 = vrot.lane.b32.xlu1 %v321_v18, %s1137_s21  ;;  %358 = vrot.lane.b32.xlu0 %v320_v19, %s1137_s21  ;;  %v444_v18 = vld [vmem:[#allocation2 + $0x408] sm:$0xff]  ;;  %v443_v19 = vld [vmem:[#allocation2 + $0x400] sm:$0xff] }
  0xa2   :  { %v1268_v24 = vpop.permute.xlu1 %118  ;;  %v1270_v25 = vpop.permute.xlu0 %116 }
  0xa3   :  { %1989 = vst [vmem:[#allocation12_spill] sm:$0xff] %v1268_v24  ;;  %1990 = vst [vmem:[#allocation13_spill] sm:$0xff] %v1270_v25 }
  0xa4   :  { %364 = vrot.lane.b32.xlu1 %v323_v22, %s1137_s21  ;;  %362 = vrot.lane.b32.xlu0 %v322_v23, %s1137_s21 }
  0xa6   :  { %v1274_v28 = vpop.permute.xlu1 %122  ;;  %v1276_v29 = vpop.permute.xlu0 %120 }
  0xa7   :  { %1991 = vst [vmem:[#allocation14_spill] sm:$0xff] %v1274_v28  ;;  %1992 = vst [vmem:[#allocation15_spill] sm:$0xff] %v1276_v29 }
  0xa8   :  { %368 = vrot.lane.b32.xlu1 %v325_v26, %s1137_s21  ;;  %366 = vrot.lane.b32.xlu0 %v324_v27, %s1137_s21  ;;  %v446_v26 = vld [vmem:[#allocation2 + $0x418] sm:$0xff]  ;;  %v445_v27 = vld [vmem:[#allocation2 + $0x410] sm:$0xff] }
  0xaa   :  { %v1280_v32 = vpop.permute.xlu1 %126  ;;  %v1282_v33 = vpop.permute.xlu0 %124 }
  0xab   :  { %1993 = vst [vmem:[#allocation16_spill] sm:$0xff] %v1280_v32  ;;  %1994 = vst [vmem:[#allocation17_spill] sm:$0xff] %v1282_v33 }
  0xac   :  { %372 = vrot.lane.b32.xlu1 %v327_v30, %s1137_s21  ;;  %370 = vrot.lane.b32.xlu0 %v326_v31, %s1137_s21 }
  0xae   :  { %v1286_v36 = vpop.permute.xlu1 %130  ;;  %v1288_v37 = vpop.permute.xlu0 %128 }
  0xaf   :  { %1995 = vst [vmem:[#allocation18_spill] sm:$0xff] %v1286_v36  ;;  %1996 = vst [vmem:[#allocation19_spill] sm:$0xff] %v1288_v37 }
  0xb0   :  { %376 = vrot.lane.b32.xlu1 %v329_v34, %s1137_s21  ;;  %374 = vrot.lane.b32.xlu0 %v328_v35, %s1137_s21  ;;  %v448_v34 = vld [vmem:[#allocation2 + $0x428] sm:$0xff]  ;;  %v447_v35 = vld [vmem:[#allocation2 + $0x420] sm:$0xff] }
  0xb2   :  { %v1292_v40 = vpop.permute.xlu1 %134  ;;  %v1294_v41 = vpop.permute.xlu0 %132 }
  0xb3   :  { %1997 = vst [vmem:[#allocation20_spill] sm:$0xff] %v1292_v40  ;;  %1998 = vst [vmem:[#allocation21_spill] sm:$0xff] %v1294_v41 }
  0xb4   :  { %380 = vrot.lane.b32.xlu1 %v331_v38, %s1137_s21  ;;  %378 = vrot.lane.b32.xlu0 %v330_v39, %s1137_s21 }
  0xb6   :  { %v1298_v44 = vpop.permute.xlu1 %138  ;;  %v1300_v45 = vpop.permute.xlu0 %136 }
  0xb7   :  { %1999 = vst [vmem:[#allocation22_spill] sm:$0xff] %v1298_v44  ;;  %2000 = vst [vmem:[#allocation23_spill] sm:$0xff] %v1300_v45 }
  0xb8   :  { %384 = vrot.lane.b32.xlu1 %v333_v42, %s1137_s21  ;;  %382 = vrot.lane.b32.xlu0 %v332_v43, %s1137_s21  ;;  %v450_v42 = vld [vmem:[#allocation2 + $0x438] sm:$0xff]  ;;  %v449_v43 = vld [vmem:[#allocation2 + $0x430] sm:$0xff] }
  0xba   :  { %v1304_v48 = vpop.permute.xlu1 %142  ;;  %v1306_v49 = vpop.permute.xlu0 %140 }
  0xbb   :  { %2001 = vst [vmem:[#allocation24_spill] sm:$0xff] %v1304_v48  ;;  %2002 = vst [vmem:[#allocation25_spill] sm:$0xff] %v1306_v49 }
  0xbc   :  { %388 = vrot.lane.b32.xlu1 %v335_v46, %s1137_s21  ;;  %386 = vrot.lane.b32.xlu0 %v334_v47, %s1137_s21 }
  0xbe   :  { %v1310_v52 = vpop.permute.xlu1 %146  ;;  %v1312_v53 = vpop.permute.xlu0 %144 }
  0xbf   :  { %2003 = vst [vmem:[#allocation26_spill] sm:$0xff] %v1310_v52  ;;  %2004 = vst [vmem:[#allocation27_spill] sm:$0xff] %v1312_v53 }
  0xc0   :  { %392 = vrot.lane.b32.xlu1 %v337_v50, %s1137_s21  ;;  %390 = vrot.lane.b32.xlu0 %v336_v51, %s1137_s21  ;;  %v452_v50 = vld [vmem:[#allocation2 + $0x448] sm:$0xff]  ;;  %v451_v51 = vld [vmem:[#allocation2 + $0x440] sm:$0xff] }
  0xc2   :  { %v1316_v56 = vpop.permute.xlu1 %150  ;;  %v1318_v57 = vpop.permute.xlu0 %148 }
  0xc4   :  { %396 = vrot.lane.b32.xlu1 %v339_v54, %s1137_s21  ;;  %394 = vrot.lane.b32.xlu0 %v338_v55, %s1137_s21 }
  0xc6   :  { %v1322_v62 = vpop.permute.xlu1 %219  ;;  %v1324_v63 = vpop.permute.xlu0 %217 }
  0xc8   :  { %400 = vrot.lane.b32.xlu1 %v341_v58, %s1137_s21  ;;  %398 = vrot.lane.b32.xlu0 %v340_v59, %s1137_s21  ;;  %v454_v58 = vld [vmem:[#allocation2 + $0x458] sm:$0xff]  ;;  %v453_v59 = vld [vmem:[#allocation2 + $0x450] sm:$0xff] }
  0xca   :  { %v1328_v6 = vpop.permute.xlu1 %223  ;;  %v1330_v7 = vpop.permute.xlu0 %221 }
  0xcc   :  { %404 = vrot.lane.b32.xlu1 %v343_v2, %s1137_s21  ;;  %402 = vrot.lane.b32.xlu0 %v342_v3, %s1137_s21 }
  0xce   :  { %v1334_v14 = vpop.permute.xlu1 %227  ;;  %v1336_v15 = vpop.permute.xlu0 %225 }
  0xd0   :  { %408 = vrot.lane.b32.xlu1 %v345_v10, %s1137_s21  ;;  %406 = vrot.lane.b32.xlu0 %v344_v11, %s1137_s21  ;;  %v456_v10 = vld [vmem:[#allocation2 + $0x468] sm:$0xff]  ;;  %v455_v11 = vld [vmem:[#allocation2 + $0x460] sm:$0xff] }
  0xd2   :  { %v1340_v22 = vpop.permute.xlu1 %231  ;;  %v1342_v23 = vpop.permute.xlu0 %229 }
  0xd4   :  { %477 = vrot.lane.b32.xlu1 %v444_v18, %s1138_s22  ;;  %475 = vrot.lane.b32.xlu0 %v443_v19, %s1138_s22 }
  0xd6   :  { %v1346_v30 = vpop.permute.xlu1 %235  ;;  %v1348_v31 = vpop.permute.xlu0 %233 }
  0xd8   :  { %481 = vrot.lane.b32.xlu1 %v446_v26, %s1138_s22  ;;  %479 = vrot.lane.b32.xlu0 %v445_v27, %s1138_s22  ;;  %v458_v26 = vld [vmem:[#allocation2 + $0x478] sm:$0xff]  ;;  %v457_v27 = vld [vmem:[#allocation2 + $0x470] sm:$0xff] }
  0xda   :  { %v1352_v38 = vpop.permute.xlu1 %239  ;;  %v1354_v39 = vpop.permute.xlu0 %237 }
  0xdb   :  { %2005 = vst [vmem:[#allocation28_spill] sm:$0xff] %v1352_v38  ;;  %2006 = vst [vmem:[#allocation29_spill] sm:$0xff] %v1354_v39 }
  0xdc   :  { %485 = vrot.lane.b32.xlu1 %v448_v34, %s1138_s22  ;;  %483 = vrot.lane.b32.xlu0 %v447_v35, %s1138_s22 }
  0xde   :  { %v1358_v46 = vpop.permute.xlu1 %243  ;;  %v1360_v47 = vpop.permute.xlu0 %241 }
  0xdf   :  { %2007 = vst [vmem:[#allocation30_spill] sm:$0xff] %v1358_v46  ;;  %2008 = vst [vmem:[#allocation31_spill] sm:$0xff] %v1360_v47 }
  0xe0   :  { %489 = vrot.lane.b32.xlu1 %v450_v42, %s1138_s22  ;;  %487 = vrot.lane.b32.xlu0 %v449_v43, %s1138_s22  ;;  %v460_v42 = vld [vmem:[#allocation2 + $0x488] sm:$0xff]  ;;  %v459_v43 = vld [vmem:[#allocation2 + $0x480] sm:$0xff] }
  0xe2   :  { %v1364_v54 = vpop.permute.xlu1 %247  ;;  %v1366_v55 = vpop.permute.xlu0 %245 }
  0xe3   :  { %2009 = vst [vmem:[#allocation32_spill] sm:$0xff] %v1364_v54  ;;  %2010 = vst [vmem:[#allocation33_spill] sm:$0xff] %v1366_v55 }
  0xe4   :  { %493 = vrot.lane.b32.xlu1 %v452_v50, %s1138_s22  ;;  %491 = vrot.lane.b32.xlu0 %v451_v51, %s1138_s22 }
  0xe6   :  { %v1370_v2 = vpop.permute.xlu1 %251  ;;  %v1372_v3 = vpop.permute.xlu0 %249 }
  0xe7   :  { %2011 = vst [vmem:[#allocation34_spill] sm:$0xff] %v1370_v2  ;;  %2012 = vst [vmem:[#allocation35_spill] sm:$0xff] %v1372_v3 }
  0xe8   :  { %497 = vrot.lane.b32.xlu1 %v454_v58, %s1138_s22  ;;  %495 = vrot.lane.b32.xlu0 %v453_v59, %s1138_s22  ;;  %v462_v58 = vld [vmem:[#allocation2 + $0x498] sm:$0xff]  ;;  %v461_v59 = vld [vmem:[#allocation2 + $0x490] sm:$0xff] }
  0xea   :  { %v1376_v18 = vpop.permute.xlu1 %255  ;;  %v1378_v19 = vpop.permute.xlu0 %253 }
  0xeb   :  { %2013 = vst [vmem:[#allocation36_spill] sm:$0xff] %v1376_v18  ;;  %2014 = vst [vmem:[#allocation37_spill] sm:$0xff] %v1378_v19 }
  0xec   :  { %501 = vrot.lane.b32.xlu1 %v456_v10, %s1138_s22  ;;  %499 = vrot.lane.b32.xlu0 %v455_v11, %s1138_s22 }
  0xee   :  { %v1382_v34 = vpop.permute.xlu1 %259  ;;  %v1384_v35 = vpop.permute.xlu0 %257 }
  0xef   :  { %2015 = vst [vmem:[#allocation38_spill] sm:$0xff] %v1382_v34  ;;  %2016 = vst [vmem:[#allocation39_spill] sm:$0xff] %v1384_v35 }
  0xf0   :  { %505 = vrot.lane.b32.xlu1 %v458_v26, %s1138_s22  ;;  %503 = vrot.lane.b32.xlu0 %v457_v27, %s1138_s22  ;;  %v464_v26 = vld [vmem:[#allocation2 + $0x4a8] sm:$0xff]  ;;  %v463_v27 = vld [vmem:[#allocation2 + $0x4a0] sm:$0xff] }
  0xf2   :  { %v1388_v50 = vpop.permute.xlu1 %263  ;;  %v1390_v51 = vpop.permute.xlu0 %261 }
  0xf3   :  { %2017 = vst [vmem:[#allocation40_spill] sm:$0xff] %v1388_v50  ;;  %2018 = vst [vmem:[#allocation41_spill] sm:$0xff] %v1390_v51 }
  0xf4   :  { %509 = vrot.lane.b32.xlu1 %v460_v42, %s1138_s22  ;;  %507 = vrot.lane.b32.xlu0 %v459_v43, %s1138_s22  ;;  %v466_v42 = vld [vmem:[#allocation2 + $0x4b8] sm:$0xff]  ;;  %v465_v43 = vld [vmem:[#allocation2 + $0x4b0] sm:$0xff] }
  0xf6   :  { %v1394_v10 = vpop.permute.xlu1 %267  ;;  %v1396_v11 = vpop.permute.xlu0 %265 }
  0xf7   :  { %2019 = vst [vmem:[#allocation42_spill] sm:$0xff] %v1394_v10  ;;  %2020 = vst [vmem:[#allocation43_spill] sm:$0xff] %v1396_v11 }
  0xf8   :  { %513 = vrot.lane.b32.xlu1 %v462_v58, %s1138_s22  ;;  %511 = vrot.lane.b32.xlu0 %v461_v59, %s1138_s22  ;;  %v468_v58 = vld [vmem:[#allocation2 + $0x4c8] sm:$0xff]  ;;  %v467_v59 = vld [vmem:[#allocation2 + $0x4c0] sm:$0xff] }
  0xfa   :  { %v1400_v53 = vpop.permute.xlu1 %271  ;;  %v1402_v52 = vpop.permute.xlu0 %269 }
  0xfb   :  { %2021 = vst [vmem:[#allocation44_spill] sm:$0xff] %v1400_v53  ;;  %2022 = vst [vmem:[#allocation45_spill] sm:$0xff] %v1402_v52 }
  0xfc   :  { %517 = vrot.lane.b32.xlu1 %v464_v26, %s1138_s22  ;;  %515 = vrot.lane.b32.xlu0 %v463_v27, %s1138_s22  ;;  %v470_v26 = vld [vmem:[#allocation2 + $0x4d8] sm:$0xff]  ;;  %v469_v27 = vld [vmem:[#allocation2 + $0x4d0] sm:$0xff] }
  0xfe   :  { %v1406_v49 = vpop.permute.xlu1 %275  ;;  %v1408_v48 = vpop.permute.xlu0 %273 }
  0xff   :  { %2023 = vst [vmem:[#allocation46_spill] sm:$0xff] %v1406_v49  ;;  %2024 = vst [vmem:[#allocation47_spill] sm:$0xff] %v1408_v48 }
 0x100   :  { %521 = vrot.lane.b32.xlu1 %v466_v42, %s1138_s22  ;;  %519 = vrot.lane.b32.xlu0 %v465_v43, %s1138_s22  ;;  %v472_v42 = vld [vmem:[#allocation2 + $0x4e8] sm:$0xff]  ;;  %v471_v43 = vld [vmem:[#allocation2 + $0x4e0] sm:$0xff] }
 0x102   :  { %v1412_v11 = vpop.permute.xlu1 %279  ;;  %v1414_v53 = vpop.permute.xlu0 %277 }
 0x104   :  { %525 = vrot.lane.b32.xlu1 %v468_v58, %s1138_s22  ;;  %523 = vrot.lane.b32.xlu0 %v467_v59, %s1138_s22  ;;  %v474_v58 = vld [vmem:[#allocation2 + $0x4f8] sm:$0xff]  ;;  %v473_v59 = vld [vmem:[#allocation2 + $0x4f0] sm:$0xff] }
 0x106   :  { %v1418_v52 = vpop.permute.xlu1 %348  ;;  %v1420_v49 = vpop.permute.xlu0 %346 }
 0x108   :  { %529 = vrot.lane.b32.xlu1 %v470_v26, %s1138_s22  ;;  %527 = vrot.lane.b32.xlu0 %v469_v27, %s1138_s22  ;;  %v573_v26 = vld [vmem:[#allocation2 + $0x508] sm:$0xff]  ;;  %v572_v27 = vld [vmem:[#allocation2 + $0x500] sm:$0xff] }
 0x10a   :  { %v1424_v48 = vpop.permute.xlu1 %352  ;;  %v1426_v10 = vpop.permute.xlu0 %350 }
 0x10c   :  { %533 = vrot.lane.b32.xlu1 %v472_v42, %s1138_s22  ;;  %531 = vrot.lane.b32.xlu0 %v471_v43, %s1138_s22  ;;  %v575_v42 = vld [vmem:[#allocation2 + $0x518] sm:$0xff]  ;;  %v574_v43 = vld [vmem:[#allocation2 + $0x510] sm:$0xff] }
 0x10e   :  { %v1430_v45 = vpop.permute.xlu1 %356  ;;  %v1432_v44 = vpop.permute.xlu0 %354 }
 0x110   :  { %537 = vrot.lane.b32.xlu1 %v474_v58, %s1138_s22  ;;  %535 = vrot.lane.b32.xlu0 %v473_v59, %s1138_s22  ;;  %v577_v58 = vld [vmem:[#allocation2 + $0x528] sm:$0xff]  ;;  %v576_v59 = vld [vmem:[#allocation2 + $0x520] sm:$0xff] }
 0x112   :  { %v1436_v51 = vpop.permute.xlu1 %360  ;;  %v1438_v50 = vpop.permute.xlu0 %358 }
 0x114   :  { %606 = vrot.lane.b32.xlu1 %v573_v26, %s1139_s23  ;;  %604 = vrot.lane.b32.xlu0 %v572_v27, %s1139_s23  ;;  %v579_v26 = vld [vmem:[#allocation2 + $0x538] sm:$0xff]  ;;  %v578_v27 = vld [vmem:[#allocation2 + $0x530] sm:$0xff] }
 0x116   :  { %v1442_v41 = vpop.permute.xlu1 %364  ;;  %v1444_v40 = vpop.permute.xlu0 %362 }
 0x117   :  { %2025 = vst [vmem:[#allocation48_spill] sm:$0xff] %v1442_v41  ;;  %2026 = vst [vmem:[#allocation49_spill] sm:$0xff] %v1444_v40 }
 0x118   :  { %610 = vrot.lane.b32.xlu1 %v575_v42, %s1139_s23  ;;  %608 = vrot.lane.b32.xlu0 %v574_v43, %s1139_s23  ;;  %v581_v42 = vld [vmem:[#allocation2 + $0x548] sm:$0xff]  ;;  %v580_v43 = vld [vmem:[#allocation2 + $0x540] sm:$0xff] }
 0x11a   :  { %v1448_v35 = vpop.permute.xlu1 %368  ;;  %v1450_v34 = vpop.permute.xlu0 %366 }
 0x11b   :  { %2027 = vst [vmem:[#allocation50_spill] sm:$0xff] %v1448_v35  ;;  %2028 = vst [vmem:[#allocation51_spill] sm:$0xff] %v1450_v34 }
 0x11c   :  { %614 = vrot.lane.b32.xlu1 %v577_v58, %s1139_s23  ;;  %612 = vrot.lane.b32.xlu0 %v576_v59, %s1139_s23  ;;  %v583_v58 = vld [vmem:[#allocation2 + $0x558] sm:$0xff]  ;;  %v582_v59 = vld [vmem:[#allocation2 + $0x550] sm:$0xff] }
 0x11e   :  { %v1454_v37 = vpop.permute.xlu1 %372  ;;  %v1456_v36 = vpop.permute.xlu0 %370 }
 0x11f   :  { %2029 = vst [vmem:[#allocation52_spill] sm:$0xff] %v1454_v37  ;;  %2030 = vst [vmem:[#allocation53_spill] sm:$0xff] %v1456_v36 }
 0x120   :  { %618 = vrot.lane.b32.xlu1 %v579_v26, %s1139_s23  ;;  %616 = vrot.lane.b32.xlu0 %v578_v27, %s1139_s23  ;;  %v585_v26 = vld [vmem:[#allocation2 + $0x568] sm:$0xff]  ;;  %v584_v27 = vld [vmem:[#allocation2 + $0x560] sm:$0xff] }
 0x122   :  { %v1460_v19 = vpop.permute.xlu1 %376  ;;  %v1462_v18 = vpop.permute.xlu0 %374 }
 0x123   :  { %2031 = vst [vmem:[#allocation54_spill] sm:$0xff] %v1460_v19  ;;  %2032 = vst [vmem:[#allocation55_spill] sm:$0xff] %v1462_v18 }
 0x124   :  { %622 = vrot.lane.b32.xlu1 %v581_v42, %s1139_s23  ;;  %620 = vrot.lane.b32.xlu0 %v580_v43, %s1139_s23  ;;  %v587_v42 = vld [vmem:[#allocation2 + $0x578] sm:$0xff]  ;;  %v586_v43 = vld [vmem:[#allocation2 + $0x570] sm:$0xff] }
 0x126   :  { %v1466_v33 = vpop.permute.xlu1 %380  ;;  %v1468_v32 = vpop.permute.xlu0 %378 }
 0x127   :  { %2033 = vst [vmem:[#allocation56_spill] sm:$0xff] %v1466_v33  ;;  %2034 = vst [vmem:[#allocation57_spill] sm:$0xff] %v1468_v32 }
 0x128   :  { %626 = vrot.lane.b32.xlu1 %v583_v58, %s1139_s23  ;;  %624 = vrot.lane.b32.xlu0 %v582_v59, %s1139_s23  ;;  %v589_v58 = vld [vmem:[#allocation2 + $0x588] sm:$0xff]  ;;  %v588_v59 = vld [vmem:[#allocation2 + $0x580] sm:$0xff] }
 0x12a   :  { %v1472_v3 = vpop.permute.xlu1 %384  ;;  %v1474_v2 = vpop.permute.xlu0 %382 }
 0x12b   :  { %2035 = vst [vmem:[#allocation58_spill] sm:$0xff] %v1472_v3  ;;  %2036 = vst [vmem:[#allocation59_spill] sm:$0xff] %v1474_v2 }
 0x12c   :  { %630 = vrot.lane.b32.xlu1 %v585_v26, %s1139_s23  ;;  %628 = vrot.lane.b32.xlu0 %v584_v27, %s1139_s23  ;;  %v591_v26 = vld [vmem:[#allocation2 + $0x598] sm:$0xff]  ;;  %v590_v27 = vld [vmem:[#allocation2 + $0x590] sm:$0xff] }
 0x12e   :  { %v1478_v18 = vpop.permute.xlu1 %388  ;;  %v1480_v33 = vpop.permute.xlu0 %386 }
 0x12f   :  { %2037 = vst [vmem:[#allocation60_spill] sm:$0xff] %v1478_v18  ;;  %2038 = vst [vmem:[#allocation61_spill] sm:$0xff] %v1480_v33 }
 0x130   :  { %634 = vrot.lane.b32.xlu1 %v587_v42, %s1139_s23  ;;  %632 = vrot.lane.b32.xlu0 %v586_v43, %s1139_s23  ;;  %v593_v42 = vld [vmem:[#allocation2 + $0x5a8] sm:$0xff]  ;;  %v592_v43 = vld [vmem:[#allocation2 + $0x5a0] sm:$0xff] }
 0x132   :  { %v1484_v32 = vpop.permute.xlu1 %392  ;;  %v1486_v3 = vpop.permute.xlu0 %390 }
 0x133   :  { %2039 = vst [vmem:[#allocation62_spill] sm:$0xff] %v1484_v32  ;;  %2040 = vst [vmem:[#allocation63_spill] sm:$0xff] %v1486_v3 }
 0x134   :  { %638 = vrot.lane.b32.xlu1 %v589_v58, %s1139_s23  ;;  %636 = vrot.lane.b32.xlu0 %v588_v59, %s1139_s23  ;;  %v595_v58 = vld [vmem:[#allocation2 + $0x5b8] sm:$0xff]  ;;  %v594_v59 = vld [vmem:[#allocation2 + $0x5b0] sm:$0xff] }
 0x136   :  { %v1490_v2 = vpop.permute.xlu1 %396  ;;  %v1492_v18 = vpop.permute.xlu0 %394 }
 0x137   :  { %2041 = vst [vmem:[#allocation64_spill] sm:$0xff] %v1490_v2  ;;  %2042 = vst [vmem:[#allocation65_spill] sm:$0xff] %v1492_v18 }
 0x138   :  { %642 = vrot.lane.b32.xlu1 %v591_v26, %s1139_s23  ;;  %640 = vrot.lane.b32.xlu0 %v590_v27, %s1139_s23  ;;  %v597_v26 = vld [vmem:[#allocation2 + $0x5c8] sm:$0xff]  ;;  %v596_v27 = vld [vmem:[#allocation2 + $0x5c0] sm:$0xff] }
 0x13a   :  { %v1496_v33 = vpop.permute.xlu1 %400  ;;  %v1498_v32 = vpop.permute.xlu0 %398 }
 0x13b   :  { %2043 = vst [vmem:[#allocation66_spill] sm:$0xff] %v1496_v33  ;;  %2044 = vst [vmem:[#allocation67_spill] sm:$0xff] %v1498_v32 }
 0x13c   :  { %646 = vrot.lane.b32.xlu1 %v593_v42, %s1139_s23  ;;  %644 = vrot.lane.b32.xlu0 %v592_v43, %s1139_s23  ;;  %v599_v42 = vld [vmem:[#allocation2 + $0x5d8] sm:$0xff]  ;;  %v598_v43 = vld [vmem:[#allocation2 + $0x5d0] sm:$0xff] }
 0x13e   :  { %v1502_v3 = vpop.permute.xlu1 %404  ;;  %v1504_v2 = vpop.permute.xlu0 %402 }
 0x13f   :  { %2045 = vst [vmem:[#allocation68_spill] sm:$0xff] %v1502_v3  ;;  %2046 = vst [vmem:[#allocation69_spill] sm:$0xff] %v1504_v2 }
 0x140   :  { %650 = vrot.lane.b32.xlu1 %v595_v58, %s1139_s23  ;;  %648 = vrot.lane.b32.xlu0 %v594_v59, %s1139_s23  ;;  %v601_v58 = vld [vmem:[#allocation2 + $0x5e8] sm:$0xff]  ;;  %v600_v59 = vld [vmem:[#allocation2 + $0x5e0] sm:$0xff] }
 0x142   :  { %v1508_v18 = vpop.permute.xlu1 %408  ;;  %v1510_v33 = vpop.permute.xlu0 %406 }
 0x144   :  { %654 = vrot.lane.b32.xlu1 %v597_v26, %s1139_s23  ;;  %652 = vrot.lane.b32.xlu0 %v596_v27, %s1139_s23  ;;  %v603_v26 = vld [vmem:[#allocation2 + $0x5f8] sm:$0xff]  ;;  %v602_v27 = vld [vmem:[#allocation2 + $0x5f0] sm:$0xff] }
 0x146   :  { %v1514_v32 = vpop.permute.xlu1 %477  ;;  %v1516_v3 = vpop.permute.xlu0 %475 }
 0x148   :  { %658 = vrot.lane.b32.xlu1 %v599_v42, %s1139_s23  ;;  %656 = vrot.lane.b32.xlu0 %v598_v43, %s1139_s23  ;;  %v702_v42 = vld [vmem:[#allocation2 + $0x608] sm:$0xff]  ;;  %v701_v43 = vld [vmem:[#allocation2 + $0x600] sm:$0xff] }
 0x14a   :  { %v1520_v2 = vpop.permute.xlu1 %481  ;;  %v1522_v19 = vpop.permute.xlu0 %479 }
 0x14c   :  { %662 = vrot.lane.b32.xlu1 %v601_v58, %s1139_s23  ;;  %660 = vrot.lane.b32.xlu0 %v600_v59, %s1139_s23  ;;  %v704_v58 = vld [vmem:[#allocation2 + $0x618] sm:$0xff]  ;;  %v703_v59 = vld [vmem:[#allocation2 + $0x610] sm:$0xff] }
 0x14e   :  { %v1526_v29 = vpop.permute.xlu1 %485  ;;  %v1528_v28 = vpop.permute.xlu0 %483 }
 0x150   :  { %666 = vrot.lane.b32.xlu1 %v603_v26, %s1139_s23  ;;  %664 = vrot.lane.b32.xlu0 %v602_v27, %s1139_s23  ;;  %v706_v26 = vld [vmem:[#allocation2 + $0x628] sm:$0xff]  ;;  %v705_v27 = vld [vmem:[#allocation2 + $0x620] sm:$0xff] }
 0x152   :  { %v1532_v55 = vpop.permute.xlu1 %489  ;;  %v1534_v54 = vpop.permute.xlu0 %487 }
 0x154   :  { %735 = vrot.lane.b32.xlu1 %v702_v42, %s1140_s24  ;;  %733 = vrot.lane.b32.xlu0 %v701_v43, %s1140_s24  ;;  %v708_v42 = vld [vmem:[#allocation2 + $0x638] sm:$0xff]  ;;  %v707_v43 = vld [vmem:[#allocation2 + $0x630] sm:$0xff] }
 0x156   :  { %v1538_v36 = vpop.permute.xlu1 %493  ;;  %v1540_v37 = vpop.permute.xlu0 %491 }
 0x157   :  { %2047 = vst [vmem:[#allocation70_spill] sm:$0xff] %v1538_v36  ;;  %2048 = vst [vmem:[#allocation71_spill] sm:$0xff] %v1540_v37 }
 0x158   :  { %739 = vrot.lane.b32.xlu1 %v704_v58, %s1140_s24  ;;  %737 = vrot.lane.b32.xlu0 %v703_v59, %s1140_s24  ;;  %v710_v58 = vld [vmem:[#allocation2 + $0x648] sm:$0xff]  ;;  %v709_v59 = vld [vmem:[#allocation2 + $0x640] sm:$0xff] }
 0x15a   :  { %v1544_v25 = vpop.permute.xlu1 %497  ;;  %v1546_v24 = vpop.permute.xlu0 %495 }
 0x15b   :  { %2049 = vst [vmem:[#allocation72_spill] sm:$0xff] %v1544_v25  ;;  %2050 = vst [vmem:[#allocation73_spill] sm:$0xff] %v1546_v24 }
 0x15c   :  { %743 = vrot.lane.b32.xlu1 %v706_v26, %s1140_s24  ;;  %741 = vrot.lane.b32.xlu0 %v705_v27, %s1140_s24  ;;  %v712_v26 = vld [vmem:[#allocation2 + $0x658] sm:$0xff]  ;;  %v711_v27 = vld [vmem:[#allocation2 + $0x650] sm:$0xff] }
 0x15e   :  { %v1550_v47 = vpop.permute.xlu1 %501  ;;  %v1552_v46 = vpop.permute.xlu0 %499 }
 0x15f   :  { %2051 = vst [vmem:[#allocation74_spill] sm:$0xff] %v1550_v47  ;;  %2052 = vst [vmem:[#allocation75_spill] sm:$0xff] %v1552_v46 }
 0x160   :  { %747 = vrot.lane.b32.xlu1 %v708_v42, %s1140_s24  ;;  %745 = vrot.lane.b32.xlu0 %v707_v43, %s1140_s24  ;;  %v714_v42 = vld [vmem:[#allocation2 + $0x668] sm:$0xff]  ;;  %v713_v43 = vld [vmem:[#allocation2 + $0x660] sm:$0xff] }
 0x162   :  { %v1556_v34 = vpop.permute.xlu1 %505  ;;  %v1558_v25 = vpop.permute.xlu0 %503 }
 0x163   :  { %2053 = vst [vmem:[#allocation76_spill] sm:$0xff] %v1556_v34  ;;  %2054 = vst [vmem:[#allocation77_spill] sm:$0xff] %v1558_v25 }
 0x164   :  { %751 = vrot.lane.b32.xlu1 %v710_v58, %s1140_s24  ;;  %749 = vrot.lane.b32.xlu0 %v709_v59, %s1140_s24  ;;  %v716_v58 = vld [vmem:[#allocation2 + $0x678] sm:$0xff]  ;;  %v715_v59 = vld [vmem:[#allocation2 + $0x670] sm:$0xff] }
 0x166   :  { %v1562_v24 = vpop.permute.xlu1 %509  ;;  %v1564_v47 = vpop.permute.xlu0 %507 }
 0x167   :  { %2055 = vst [vmem:[#allocation78_spill] sm:$0xff] %v1562_v24  ;;  %2056 = vst [vmem:[#allocation79_spill] sm:$0xff] %v1564_v47 }
 0x168   :  { %755 = vrot.lane.b32.xlu1 %v712_v26, %s1140_s24  ;;  %753 = vrot.lane.b32.xlu0 %v711_v27, %s1140_s24  ;;  %v718_v26 = vld [vmem:[#allocation2 + $0x688] sm:$0xff]  ;;  %v717_v27 = vld [vmem:[#allocation2 + $0x680] sm:$0xff] }
 0x16a   :  { %v1568_v46 = vpop.permute.xlu1 %513  ;;  %v1570_v34 = vpop.permute.xlu0 %511 }
 0x16b   :  { %2057 = vst [vmem:[#allocation80_spill] sm:$0xff] %v1568_v46  ;;  %2058 = vst [vmem:[#allocation81_spill] sm:$0xff] %v1570_v34 }
 0x16c   :  { %759 = vrot.lane.b32.xlu1 %v714_v42, %s1140_s24  ;;  %757 = vrot.lane.b32.xlu0 %v713_v43, %s1140_s24  ;;  %v720_v42 = vld [vmem:[#allocation2 + $0x698] sm:$0xff]  ;;  %v719_v43 = vld [vmem:[#allocation2 + $0x690] sm:$0xff] }
 0x16e   :  { %v1574_v25 = vpop.permute.xlu1 %517  ;;  %v1576_v24 = vpop.permute.xlu0 %515 }
 0x16f   :  { %2059 = vst [vmem:[#allocation82_spill] sm:$0xff] %v1574_v25  ;;  %2060 = vst [vmem:[#allocation83_spill] sm:$0xff] %v1576_v24 }
 0x170   :  { %763 = vrot.lane.b32.xlu1 %v716_v58, %s1140_s24  ;;  %761 = vrot.lane.b32.xlu0 %v715_v59, %s1140_s24  ;;  %v722_v58 = vld [vmem:[#allocation2 + $0x6a8] sm:$0xff]  ;;  %v721_v59 = vld [vmem:[#allocation2 + $0x6a0] sm:$0xff] }
 0x172   :  { %v1580_v47 = vpop.permute.xlu1 %521  ;;  %v1582_v46 = vpop.permute.xlu0 %519 }
 0x173   :  { %2061 = vst [vmem:[#allocation84_spill] sm:$0xff] %v1580_v47  ;;  %2062 = vst [vmem:[#allocation85_spill] sm:$0xff] %v1582_v46 }
 0x174   :  { %767 = vrot.lane.b32.xlu1 %v718_v26, %s1140_s24  ;;  %765 = vrot.lane.b32.xlu0 %v717_v27, %s1140_s24  ;;  %v724_v26 = vld [vmem:[#allocation2 + $0x6b8] sm:$0xff]  ;;  %v723_v27 = vld [vmem:[#allocation2 + $0x6b0] sm:$0xff] }
 0x176   :  { %v1586_v34 = vpop.permute.xlu1 %525  ;;  %v1588_v25 = vpop.permute.xlu0 %523 }
 0x177   :  { %2063 = vst [vmem:[#allocation86_spill] sm:$0xff] %v1586_v34  ;;  %2064 = vst [vmem:[#allocation87_spill] sm:$0xff] %v1588_v25 }
 0x178   :  { %771 = vrot.lane.b32.xlu1 %v720_v42, %s1140_s24  ;;  %769 = vrot.lane.b32.xlu0 %v719_v43, %s1140_s24  ;;  %v726_v42 = vld [vmem:[#allocation2 + $0x6c8] sm:$0xff]  ;;  %v725_v43 = vld [vmem:[#allocation2 + $0x6c0] sm:$0xff] }
 0x17a   :  { %v1592_v24 = vpop.permute.xlu1 %529  ;;  %v1594_v47 = vpop.permute.xlu0 %527 }
 0x17b   :  { %2065 = vst [vmem:[#allocation88_spill] sm:$0xff] %v1592_v24  ;;  %2066 = vst [vmem:[#allocation89_spill] sm:$0xff] %v1594_v47 }
 0x17c   :  { %775 = vrot.lane.b32.xlu1 %v722_v58, %s1140_s24  ;;  %773 = vrot.lane.b32.xlu0 %v721_v59, %s1140_s24  ;;  %v728_v58 = vld [vmem:[#allocation2 + $0x6d8] sm:$0xff]  ;;  %v727_v59 = vld [vmem:[#allocation2 + $0x6d0] sm:$0xff] }
 0x17e   :  { %v1598_v46 = vpop.permute.xlu1 %533  ;;  %v1600_v34 = vpop.permute.xlu0 %531 }
 0x17f   :  { %2067 = vst [vmem:[#allocation90_spill] sm:$0xff] %v1598_v46  ;;  %2068 = vst [vmem:[#allocation91_spill] sm:$0xff] %v1600_v34 }
 0x180   :  { %779 = vrot.lane.b32.xlu1 %v724_v26, %s1140_s24  ;;  %777 = vrot.lane.b32.xlu0 %v723_v27, %s1140_s24  ;;  %v730_v26 = vld [vmem:[#allocation2 + $0x6e8] sm:$0xff]  ;;  %v729_v27 = vld [vmem:[#allocation2 + $0x6e0] sm:$0xff] }
 0x182   :  { %v1604_v25 = vpop.permute.xlu1 %537  ;;  %v1606_v24 = vpop.permute.xlu0 %535 }
 0x184   :  { %783 = vrot.lane.b32.xlu1 %v726_v42, %s1140_s24  ;;  %781 = vrot.lane.b32.xlu0 %v725_v43, %s1140_s24  ;;  %v732_v42 = vld [vmem:[#allocation2 + $0x6f8] sm:$0xff]  ;;  %v731_v43 = vld [vmem:[#allocation2 + $0x6f0] sm:$0xff] }
 0x186   :  { %v1610_v47 = vpop.permute.xlu1 %606  ;;  %v1612_v46 = vpop.permute.xlu0 %604 }
 0x188   :  { %787 = vrot.lane.b32.xlu1 %v728_v58, %s1140_s24  ;;  %785 = vrot.lane.b32.xlu0 %v727_v59, %s1140_s24  ;;  %v831_v58 = vld [vmem:[#allocation2 + $0x708] sm:$0xff]  ;;  %v830_v59 = vld [vmem:[#allocation2 + $0x700] sm:$0xff] }
 0x18a   :  { %v1616_v34 = vpop.permute.xlu1 %610  ;;  %v1618_v35 = vpop.permute.xlu0 %608 }
 0x18c   :  { %791 = vrot.lane.b32.xlu1 %v730_v26, %s1140_s24  ;;  %789 = vrot.lane.b32.xlu0 %v729_v27, %s1140_s24  ;;  %v833_v26 = vld [vmem:[#allocation2 + $0x718] sm:$0xff]  ;;  %v832_v27 = vld [vmem:[#allocation2 + $0x710] sm:$0xff] }
 0x18e   :  { %v1622_v21 = vpop.permute.xlu1 %614  ;;  %v1624_v20 = vpop.permute.xlu0 %612 }
 0x190   :  { %795 = vrot.lane.b32.xlu1 %v732_v42, %s1140_s24  ;;  %793 = vrot.lane.b32.xlu0 %v731_v43, %s1140_s24  ;;  %v835_v42 = vld [vmem:[#allocation2 + $0x728] sm:$0xff]  ;;  %v834_v43 = vld [vmem:[#allocation2 + $0x720] sm:$0xff] }
 0x192   :  { %v1628_v37 = vpop.permute.xlu1 %618  ;;  %v1630_v36 = vpop.permute.xlu0 %616 }
 0x193   :  { %2069 = vst [vmem:[#allocation92_spill] sm:$0xff] %v1628_v37  ;;  %2070 = vst [vmem:[#allocation93_spill] sm:$0xff] %v1630_v36 }
 0x194   :  { %864 = vrot.lane.b32.xlu1 %v831_v58, %s1141_s25  ;;  %862 = vrot.lane.b32.xlu0 %v830_v59, %s1141_s25  ;;  %v837_v58 = vld [vmem:[#allocation2 + $0x738] sm:$0xff]  ;;  %v836_v59 = vld [vmem:[#allocation2 + $0x730] sm:$0xff] }
 0x196   :  { %v1634_v39 = vpop.permute.xlu1 %622  ;;  %v1636_v38 = vpop.permute.xlu0 %620 }
 0x197   :  { %2071 = vst [vmem:[#allocation94_spill] sm:$0xff] %v1634_v39  ;;  %2072 = vst [vmem:[#allocation95_spill] sm:$0xff] %v1636_v38 }
 0x198   :  { %868 = vrot.lane.b32.xlu1 %v833_v26, %s1141_s25  ;;  %866 = vrot.lane.b32.xlu0 %v832_v27, %s1141_s25  ;;  %v839_v26 = vld [vmem:[#allocation2 + $0x748] sm:$0xff]  ;;  %v838_v27 = vld [vmem:[#allocation2 + $0x740] sm:$0xff] }
 0x19a   :  { %v1640_v37 = vpop.permute.xlu1 %626  ;;  %v1642_v36 = vpop.permute.xlu0 %624 }
 0x19b   :  { %2073 = vst [vmem:[#allocation96_spill] sm:$0xff] %v1640_v37  ;;  %2074 = vst [vmem:[#allocation97_spill] sm:$0xff] %v1642_v36 }
 0x19c   :  { %872 = vrot.lane.b32.xlu1 %v835_v42, %s1141_s25  ;;  %870 = vrot.lane.b32.xlu0 %v834_v43, %s1141_s25  ;;  %v841_v42 = vld [vmem:[#allocation2 + $0x758] sm:$0xff]  ;;  %v840_v43 = vld [vmem:[#allocation2 + $0x750] sm:$0xff] }
 0x19e   :  { %v1646_v40 = vpop.permute.xlu1 %630  ;;  %v1648_v39 = vpop.permute.xlu0 %628 }
 0x19f   :  { %2075 = vst [vmem:[#allocation98_spill] sm:$0xff] %v1646_v40  ;;  %2076 = vst [vmem:[#allocation99_spill] sm:$0xff] %v1648_v39 }
 0x1a0   :  { %876 = vrot.lane.b32.xlu1 %v837_v58, %s1141_s25  ;;  %874 = vrot.lane.b32.xlu0 %v836_v59, %s1141_s25  ;;  %v843_v58 = vld [vmem:[#allocation2 + $0x768] sm:$0xff]  ;;  %v842_v59 = vld [vmem:[#allocation2 + $0x760] sm:$0xff] }
 0x1a2   :  { %v1652_v38 = vpop.permute.xlu1 %634  ;;  %v1654_v37 = vpop.permute.xlu0 %632 }
 0x1a3   :  { %2077 = vst [vmem:[#allocation100_spill] sm:$0xff] %v1652_v38  ;;  %2078 = vst [vmem:[#allocation101_spill] sm:$0xff] %v1654_v37 }
 0x1a4   :  { %880 = vrot.lane.b32.xlu1 %v839_v26, %s1141_s25  ;;  %878 = vrot.lane.b32.xlu0 %v838_v27, %s1141_s25  ;;  %v845_v26 = vld [vmem:[#allocation2 + $0x778] sm:$0xff]  ;;  %v844_v27 = vld [vmem:[#allocation2 + $0x770] sm:$0xff] }
 0x1a6   :  { %v1658_v36 = vpop.permute.xlu1 %638  ;;  %v1660_v40 = vpop.permute.xlu0 %636 }
 0x1a7   :  { %2079 = vst [vmem:[#allocation102_spill] sm:$0xff] %v1658_v36  ;;  %2080 = vst [vmem:[#allocation103_spill] sm:$0xff] %v1660_v40 }
 0x1a8   :  { %884 = vrot.lane.b32.xlu1 %v841_v42, %s1141_s25  ;;  %882 = vrot.lane.b32.xlu0 %v840_v43, %s1141_s25  ;;  %v847_v42 = vld [vmem:[#allocation2 + $0x788] sm:$0xff]  ;;  %v846_v43 = vld [vmem:[#allocation2 + $0x780] sm:$0xff] }
 0x1aa   :  { %v1664_v39 = vpop.permute.xlu1 %642  ;;  %v1666_v38 = vpop.permute.xlu0 %640 }
 0x1ab   :  { %2081 = vst [vmem:[#allocation104_spill] sm:$0xff] %v1664_v39  ;;  %2082 = vst [vmem:[#allocation105_spill] sm:$0xff] %v1666_v38 }
 0x1ac   :  { %888 = vrot.lane.b32.xlu1 %v843_v58, %s1141_s25  ;;  %886 = vrot.lane.b32.xlu0 %v842_v59, %s1141_s25  ;;  %v849_v58 = vld [vmem:[#allocation2 + $0x798] sm:$0xff]  ;;  %v848_v59 = vld [vmem:[#allocation2 + $0x790] sm:$0xff] }
 0x1ae   :  { %v1670_v37 = vpop.permute.xlu1 %646  ;;  %v1672_v36 = vpop.permute.xlu0 %644 }
 0x1af   :  { %2083 = vst [vmem:[#allocation106_spill] sm:$0xff] %v1670_v37  ;;  %2084 = vst [vmem:[#allocation107_spill] sm:$0xff] %v1672_v36  ;;  %v54_v36 = vld [vmem:[#allocation2 + $0xf8] sm:$0xff] }
 0x1b0   :  { %892 = vrot.lane.b32.xlu1 %v845_v26, %s1141_s25  ;;  %890 = vrot.lane.b32.xlu0 %v844_v27, %s1141_s25  ;;  %v53_v26 = vld [vmem:[#allocation2 + $0xf0] sm:$0xff]  ;;  %v851_v27 = vld [vmem:[#allocation2 + $0x7a8] sm:$0xff] }
 0x1b2   :  { %v1676_v40 = vpop.permute.xlu1 %650  ;;  %v1678_v39 = vpop.permute.xlu0 %648 }
 0x1b3   :  { %2085 = vst [vmem:[#allocation108_spill] sm:$0xff] %v1676_v40  ;;  %2086 = vst [vmem:[#allocation109_spill] sm:$0xff] %v1678_v39  ;;  %v850_v40 = vld [vmem:[#allocation2 + $0x7a0] sm:$0xff] }
 0x1b4   :  { %896 = vrot.lane.b32.xlu1 %v847_v42, %s1141_s25  ;;  %894 = vrot.lane.b32.xlu0 %v846_v43, %s1141_s25  ;;  %v183_v42 = vadd.f32 %v1316_v56, %v54_v36  ;;  %v182_v43 = vadd.f32 %v1318_v57, %v53_v26  ;;  %v855_v57 = vld [vmem:[#allocation2 + $0x7c8] sm:$0xff] }
 0x1b6   :  { %v1682_v38 = vpop.permute.xlu1 %654  ;;  %v1684_v37 = vpop.permute.xlu0 %652 }
 0x1b7   :  { %2087 = vst [vmem:[#allocation110_spill] sm:$0xff] %v1682_v38  ;;  %2088 = vst [vmem:[#allocation111_spill] sm:$0xff] %v1684_v37  ;;  %v312_v37 = vadd.f32 %v1412_v11, %v183_v42  ;;  %v853_v38 = vld [vmem:[#allocation2 + $0x7b8] sm:$0xff] }
 0x1b8   :  { %900 = vrot.lane.b32.xlu1 %v849_v58, %s1141_s25  ;;  %898 = vrot.lane.b32.xlu0 %v848_v59, %s1141_s25  ;;  %v311_v58 = vadd.f32 %v1414_v53, %v182_v43  ;;  %v852_v59 = vld [vmem:[#allocation2 + $0x7b0] sm:$0xff]  ;;  %v854_v53 = vld [vmem:[#allocation2 + $0x7c0] sm:$0xff]  ;;  %v857_v43 = vld [vmem:[#allocation2 + $0x7d8] sm:$0xff] }
 0x1ba   :  { %v1688_v41 = vpop.permute.xlu1 %658  ;;  %v1690_v39 = vpop.permute.xlu0 %656  ;;  %v440_v36 = vadd.f32 %v1510_v33, %v311_v58  ;;  %v991_v33 = vld [vmem:[#allocation2 + $0x800] sm:$0xff] }
 0x1bb   :  { %2089 = vst [vmem:[#allocation112_spill] sm:$0xff] %v1688_v41  ;;  %2090 = vst [vmem:[#allocation113_spill] sm:$0xff] %v1690_v39  ;;  %v441_v39 = vadd.f32 %v1508_v18, %v312_v37  ;;  %v856_v37 = vld [vmem:[#allocation2 + $0x7d0] sm:$0xff] }
 0x1bc   :  { %904 = vrot.lane.b32.xlu1 %v851_v27, %s1141_s25  ;;  %902 = vrot.lane.b32.xlu0 %v850_v40, %s1141_s25  ;;  %v569_v56 = vadd.f32 %v1606_v24, %v440_v36  ;;  %v993_v18 = vld [vmem:[#allocation2 + $0x810] sm:$0xff]  ;;  %v996_v24 = vld [vmem:[#allocation2 + $0x828] sm:$0xff]  ;;  %1024 = vst [vmem:[#allocation5 + $0x100] sm:$0xff] %v991_v33  ;;  %v1003_v33 = vld [vmem:[#allocation2 + $0x860] sm:$0xff] }
 0x1bd   :  { %v570_v40 = vadd.f32 %v1604_v25, %v441_v39  ;;  %v994_v25 = vld [vmem:[#allocation2 + $0x818] sm:$0xff]  ;;  %v995_v39 = vld [vmem:[#allocation2 + $0x820] sm:$0xff]  ;;  %1026 = vst [vmem:[#allocation5 + $0x110] sm:$0xff] %v993_v18  ;;  %v997_v36 = vld [vmem:[#allocation2 + $0x830] sm:$0xff] }
 0x1be   :  { %v1698_v17 = vpop.permute.xlu1 %662  ;;  %v1700_v16 = vpop.permute.xlu0 %660  ;;  %1027 = vst [vmem:[#allocation5 + $0x118] sm:$0xff] %v994_v25  ;;  %1028 = vst [vmem:[#allocation5 + $0x120] sm:$0xff] %v995_v39  ;;  %v1005_v18 = vld [vmem:[#allocation2 + $0x870] sm:$0xff]  ;;  %v1006_v25 = vld [vmem:[#allocation2 + $0x878] sm:$0xff] }
 0x1bf   :  { %2091 = vst [vmem:[#allocation114_spill] sm:$0xff] %v1698_v17  ;;  %2092 = vst [vmem:[#allocation115_spill] sm:$0xff] %v1700_v16  ;;  %v1007_v39 = vld [vmem:[#allocation2 + $0x880] sm:$0xff]  ;;  %v1014_v16 = vld [vmem:[#allocation2 + $0x8b8] sm:$0xff] }
 0x1c0   :  { %908 = vrot.lane.b32.xlu1 %v853_v38, %s1141_s25  ;;  %906 = vrot.lane.b32.xlu0 %v852_v59, %s1141_s25  ;;  %v992_v38 = vld [vmem:[#allocation2 + $0x808] sm:$0xff]  ;;  %1029 = vst [vmem:[#allocation5 + $0x128] sm:$0xff] %v996_v24  ;;  %1030 = vst [vmem:[#allocation5 + $0x130] sm:$0xff] %v997_v36 }
 0x1c1   :  { %1025 = vst [vmem:[#allocation5 + $0x108] sm:$0xff] %v992_v38  ;;  %v1004_v38 = vld [vmem:[#allocation2 + $0x868] sm:$0xff]  ;;  %1036 = vst [vmem:[#allocation5 + $0x160] sm:$0xff] %v1003_v33  ;;  %v1015_v33 = vld [vmem:[#allocation2 + $0x8c0] sm:$0xff] }
 0x1c2   :  { %v667_v11 = vpop.permute.xlu1 %666  ;;  %v665_v26 = vpop.permute.xlu0 %664  ;;  %v1008_v24 = vld [vmem:[#allocation2 + $0x888] sm:$0xff]  ;;  %1037 = vst [vmem:[#allocation5 + $0x168] sm:$0xff] %v1004_v38  ;;  %1038 = vst [vmem:[#allocation5 + $0x170] sm:$0xff] %v1005_v18  ;;  %v1017_v18 = vld [vmem:[#allocation2 + $0x8d0] sm:$0xff] }
 0x1c3   :  { %v1708_v27 = vadd.f32 %v667_v11, %v570_v40  ;;  %v1710_v42 = vadd.f32 %v665_v26, %v569_v56  ;;  %v998_v40 = vld [vmem:[#allocation2 + $0x838] sm:$0xff]  ;;  %v999_v56 = vld [vmem:[#allocation2 + $0x840] sm:$0xff]  ;;  %v1000_v11 = vld [vmem:[#allocation2 + $0x848] sm:$0xff]  ;;  %1039 = vst [vmem:[#allocation5 + $0x178] sm:$0xff] %v1006_v25 }
 0x1c4   :  { %912 = vrot.lane.b32.xlu1 %v855_v57, %s1141_s25  ;;  %910 = vrot.lane.b32.xlu0 %v854_v53, %s1141_s25  ;;  %v859_v57 = vld [vmem:[#allocation2 + $0x7e8] sm:$0xff]  ;;  %v858_v53 = vld [vmem:[#allocation2 + $0x7e0] sm:$0xff]  ;;  %v1001_v26 = vld [vmem:[#allocation2 + $0x850] sm:$0xff]  ;;  %1031 = vst [vmem:[#allocation5 + $0x138] sm:$0xff] %v998_v40 }
 0x1c5   :  { %2093 = vst [vmem:[#allocation116_spill] sm:$0xff] %v1708_v27  ;;  %2094 = vst [vmem:[#allocation117_spill] sm:$0xff] %v1710_v42  ;;  %v1002_v42 = vld [vmem:[#allocation2 + $0x858] sm:$0xff]  ;;  %v1009_v40 = vld [vmem:[#allocation2 + $0x890] sm:$0xff] }
 0x1c6   :  { %v1714_v58 = vpop.permute.xlu1 %735  ;;  %v1716_v59 = vpop.permute.xlu0 %733  ;;  %1032 = vst [vmem:[#allocation5 + $0x140] sm:$0xff] %v999_v56  ;;  %1033 = vst [vmem:[#allocation5 + $0x148] sm:$0xff] %v1000_v11  ;;  %v1011_v56 = vld [vmem:[#allocation2 + $0x8a0] sm:$0xff]  ;;  %v860_v11 = vld [vmem:[#allocation2 + $0x7f0] sm:$0xff] }
 0x1c7   :  { %1034 = vst [vmem:[#allocation5 + $0x150] sm:$0xff] %v1001_v26  ;;  %1035 = vst [vmem:[#allocation5 + $0x158] sm:$0xff] %v1002_v42  ;;  %v1012_v26 = vld [vmem:[#allocation2 + $0x8a8] sm:$0xff]  ;;  %v1013_v42 = vld [vmem:[#allocation2 + $0x8b0] sm:$0xff] }
 0x1c8   :  { %916 = vrot.lane.b32.xlu1 %v857_v43, %s1141_s25  ;;  %914 = vrot.lane.b32.xlu0 %v856_v37, %s1141_s25  ;;  %v1010_v43 = vld [vmem:[#allocation2 + $0x898] sm:$0xff]  ;;  %1040 = vst [vmem:[#allocation5 + $0x180] sm:$0xff] %v1007_v39  ;;  %1041 = vst [vmem:[#allocation5 + $0x188] sm:$0xff] %v1008_v24  ;;  %v1016_v38 = vld [vmem:[#allocation2 + $0x8c8] sm:$0xff] }
 0x1c9   :  { %v861_v37 = vld [vmem:[#allocation2 + $0x7f8] sm:$0xff]  ;;  %1042 = vst [vmem:[#allocation5 + $0x190] sm:$0xff] %v1009_v40  ;;  %1043 = vst [vmem:[#allocation5 + $0x198] sm:$0xff] %v1010_v43  ;;  %v1019_v39 = vld [vmem:[#allocation2 + $0x8e0] sm:$0xff] }
 0x1ca   :  { %v1720_v27 = vpop.permute.xlu1 %739  ;;  %v1722_v36 = vpop.permute.xlu0 %737  ;;  %1044 = vst [vmem:[#allocation5 + $0x1a0] sm:$0xff] %v1011_v56  ;;  %1045 = vst [vmem:[#allocation5 + $0x1a8] sm:$0xff] %v1012_v26  ;;  %v1018_v25 = vld [vmem:[#allocation2 + $0x8d8] sm:$0xff]  ;;  %v1020_v24 = vld [vmem:[#allocation2 + $0x8e8] sm:$0xff] }
 0x1cb   :  { %1046 = vst [vmem:[#allocation5 + $0x1b0] sm:$0xff] %v1013_v42  ;;  %1047 = vst [vmem:[#allocation5 + $0x1b8] sm:$0xff] %v1014_v16  ;;  %v1021_v43 = vld [vmem:[#allocation2 + $0x8f0] sm:$0xff] }
 0x1cc   :  { %920 = vrot.lane.b32.xlu1 %v859_v57, %s1141_s25  ;;  %918 = vrot.lane.b32.xlu0 %v858_v53, %s1141_s25  ;;  %1048 = vst [vmem:[#allocation5 + $0x1c0] sm:$0xff] %v1015_v33  ;;  %1049 = vst [vmem:[#allocation5 + $0x1c8] sm:$0xff] %v1016_v38  ;;  %v1022_v57 = vld [vmem:[#allocation2 + $0x8f8] sm:$0xff] }
 0x1cd   :  { %1050 = vst [vmem:[#allocation5 + $0x1d0] sm:$0xff] %v1017_v18  ;;  %1051 = vst [vmem:[#allocation5 + $0x1d8] sm:$0xff] %v1018_v25 }
 0x1ce   :  { %v1726_v17 = vpop.permute.xlu1 %743  ;;  %v1728_v40 = vpop.permute.xlu0 %741  ;;  %1052 = vst [vmem:[#allocation5 + $0x1e0] sm:$0xff] %v1019_v39  ;;  %1053 = vst [vmem:[#allocation5 + $0x1e8] sm:$0xff] %v1020_v24 }
 0x1cf   :  { %1054 = vst [vmem:[#allocation5 + $0x1f0] sm:$0xff] %v1021_v43  ;;  %1055 = vst [vmem:[#allocation5 + $0x1f8] sm:$0xff] %v1022_v57 }
 0x1d0   :  { %924 = vrot.lane.b32.xlu1 %v861_v37, %s1141_s25  ;;  %922 = vrot.lane.b32.xlu0 %v860_v11, %s1141_s25 }
 0x1d2   :  { %v1732_v16 = vpop.permute.xlu1 %747  ;;  %v1734_v53 = vpop.permute.xlu0 %745 }
 0x1d6   :  { %v1736_v56 = vpop.permute.xlu1 %751  ;;  %v1738_v26 = vpop.permute.xlu0 %749 }
 0x1d7   :  { %2095 = vst [vmem:[#allocation118_spill] sm:$0xff] %v1736_v56  ;;  %2096 = vst [vmem:[#allocation119_spill] sm:$0xff] %v1738_v26  ;;  %v28_v56 = vld [vmem:[#allocation2 + $0x28] sm:$0xff] }
 0x1da   :  { %v1740_v42 = vpop.permute.xlu1 %755  ;;  %v1742_v33 = vpop.permute.xlu0 %753 }
 0x1db   :  { %2097 = vst [vmem:[#allocation120_spill] sm:$0xff] %v1740_v42  ;;  %2098 = vst [vmem:[#allocation121_spill] sm:$0xff] %v1742_v33 }
 0x1de   :  { %v1744_v38 = vpop.permute.xlu1 %759  ;;  %v1746_v18 = vpop.permute.xlu0 %757 }
 0x1df   :  { %2099 = vst [vmem:[#allocation122_spill] sm:$0xff] %v1744_v38  ;;  %2100 = vst [vmem:[#allocation123_spill] sm:$0xff] %v1746_v18 }
 0x1e2   :  { %v1748_v25 = vpop.permute.xlu1 %763  ;;  %v1750_v37 = vpop.permute.xlu0 %761 }
 0x1e3   :  { %2101 = vst [vmem:[#allocation124_spill] sm:$0xff] %v1748_v25  ;;  %2102 = vst [vmem:[#allocation125_spill] sm:$0xff] %v1750_v37  ;;  %v23_v37 = vld [vmem:[#allocation2] sm:$0xff] }
 0x1e6   :  { %v1752_v11 = vpop.permute.xlu1 %767  ;;  %v1754_v39 = vpop.permute.xlu0 %765 }
 0x1e7   :  { %2103 = vst [vmem:[#allocation126_spill] sm:$0xff] %v1752_v11  ;;  %2104 = vst [vmem:[#allocation127_spill] sm:$0xff] %v1754_v39  ;;  %v24_v11 = vld [vmem:[#allocation2 + $0x8] sm:$0xff] }
 0x1ea   :  { %v1756_v24 = vpop.permute.xlu1 %771  ;;  %v1758_v43 = vpop.permute.xlu0 %769 }
 0x1eb   :  { %2105 = vst [vmem:[#allocation128_spill] sm:$0xff] %v1756_v24  ;;  %2106 = vst [vmem:[#allocation129_spill] sm:$0xff] %v1758_v43  ;;  %v152_v43 = vadd.f32 %v1228_v61, %v23_v37  ;;  %v25_v24 = vld [vmem:[#allocation2 + $0x10] sm:$0xff] }
 0x1ee   :  { %v1760_v57 = vpop.permute.xlu1 %775  ;;  %v1762_v41 = vpop.permute.xlu0 %773 }
 0x1ef   :  { %2107 = vst [vmem:[#allocation130_spill] sm:$0xff] %v1760_v57  ;;  %2108 = vst [vmem:[#allocation131_spill] sm:$0xff] %v1762_v41  ;;  %v153_v57 = vadd.f32 %v1234_v1, %v24_v11  ;;  %v26_v41 = vld [vmem:[#allocation2 + $0x18] sm:$0xff] }
 0x1f2   :  { %v1764_v33 = vpop.permute.xlu1 %779  ;;  %v1766_v38 = vpop.permute.xlu0 %777 }
 0x1f3   :  { %2109 = vst [vmem:[#allocation132_spill] sm:$0xff] %v1764_v33  ;;  %2110 = vst [vmem:[#allocation133_spill] sm:$0xff] %v1766_v38  ;;  %v282_v33 = vadd.f32 %v1322_v62, %v153_v57  ;;  %v281_v38 = vadd.f32 %v1324_v63, %v152_v43  ;;  %v157_v43 = vadd.f32 %v1238_v4, %v28_v56 }
 0x1f5   :  { %v411_v61 = vadd.f32 %v1418_v52, %v282_v33  ;;  %v410_v1 = vadd.f32 %v1420_v49, %v281_v38  ;;  %v29_v52 = vld [vmem:[#allocation2 + $0x30] sm:$0xff] }
 0x1f6   :  { %v1768_v18 = vpop.permute.xlu1 %783  ;;  %v1770_v25 = vpop.permute.xlu0 %781 }
 0x1f7   :  { %2111 = vst [vmem:[#allocation134_spill] sm:$0xff] %v1768_v18  ;;  %2112 = vst [vmem:[#allocation135_spill] sm:$0xff] %v1770_v25  ;;  %v154_v25 = vadd.f32 %v1226_v60, %v25_v24  ;;  %v540_v63 = vadd.f32 %v1514_v32, %v411_v61  ;;  %v539_v11 = vadd.f32 %v1516_v3, %v410_v1 }
 0x1f8   :  { %v286_v3 = vadd.f32 %v1334_v14, %v157_v43  ;;  %v2115_v43 = vld [vmem:[#allocation8_spill] sm:$0xff] }
 0x1f9   :  { %v283_v62 = vadd.f32 %v1330_v7, %v154_v25  ;;  %v669_v7 = vadd.f32 %v1610_v47, %v540_v63  ;;  %v668_v32 = vadd.f32 %v1612_v46, %v539_v11  ;;  %v32_v25 = vld [vmem:[#allocation2 + $0x48] sm:$0xff] }
 0x1fa   :  { %v1772_v42 = vpop.permute.xlu1 %787  ;;  %v1774_v39 = vpop.permute.xlu0 %785  ;;  %v415_v47 = vadd.f32 %v1430_v45, %v286_v3  ;;  %v2120_v3 = vld [vmem:[#allocation93_spill] sm:$0xff] }
 0x1fb   :  { %2113 = vst [vmem:[#allocation136_spill] sm:$0xff] %v1772_v42  ;;  %2114 = vst [vmem:[#allocation137_spill] sm:$0xff] %v1774_v39  ;;  %v155_v42 = vadd.f32 %v1232_v0, %v26_v41  ;;  %v27_v39 = vld [vmem:[#allocation2 + $0x20] sm:$0xff]  ;;  %v30_v41 = vld [vmem:[#allocation2 + $0x38] sm:$0xff]  ;;  %v797_v33 = vadd.f32 %v1716_v59, %v668_v32 }
 0x1fc   :  { %v156_v60 = vadd.f32 %v1240_v5, %v27_v39  ;;  %v2119_v32 = vld [vmem:[#allocation92_spill] sm:$0xff] }
 0x1fd   :  { %v284_v37 = vadd.f32 %v1328_v6, %v155_v42  ;;  %v412_v6 = vadd.f32 %v1426_v10, %v283_v62  ;;  %v798_v42 = vadd.f32 %v1714_v58, %v669_v7  ;;  %v158_v10 = vadd.f32 %v1246_v9, %v29_v52  ;;  %v36_v7 = vld [vmem:[#allocation2 + $0x68] sm:$0xff] }
 0x1fe   :  { %v1780_v26 = vpop.permute.xlu1 %791  ;;  %v1782_v18 = vpop.permute.xlu0 %789  ;;  %v285_v4 = vadd.f32 %v1336_v15, %v156_v60  ;;  %v31_v15 = vld [vmem:[#allocation2 + $0x40] sm:$0xff]  ;;  %v544_v9 = vadd.f32 %v1526_v29, %v415_v47  ;;  %v33_v29 = vld [vmem:[#allocation2 + $0x50] sm:$0xff]  ;;  %v2116_v60 = vld [vmem:[#allocation9_spill] sm:$0xff] }
 0x1ff   :  { %v413_v49 = vadd.f32 %v1424_v48, %v284_v37  ;;  %v541_v56 = vadd.f32 %v1522_v19, %v412_v6  ;;  %v159_v48 = vadd.f32 %v1244_v8, %v30_v41  ;;  %v287_v8 = vadd.f32 %v1342_v23, %v158_v10  ;;  %v34_v37 = vld [vmem:[#allocation2 + $0x58] sm:$0xff]  ;;  %v2117_v41 = vld [vmem:[#allocation48_spill] sm:$0xff] }
 0x200   :  { %v414_v46 = vadd.f32 %v1432_v44, %v285_v4  ;;  %v2124_v47 = vld [vmem:[#allocation71_spill] sm:$0xff] }
 0x201   :  { %v542_v5 = vadd.f32 %v1520_v2, %v413_v49  ;;  %v670_v19 = vadd.f32 %v1618_v35, %v541_v56  ;;  %v288_v59 = vadd.f32 %v1340_v22, %v159_v48  ;;  %v160_v35 = vadd.f32 %v1252_v13, %v31_v15  ;;  %v2118_v49 = vld [vmem:[#allocation49_spill] sm:$0xff]  ;;  %v2123_v48 = vld [vmem:[#allocation70_spill] sm:$0xff] }
 0x202   :  { %v1794_v24 = vpop.permute.xlu1 %795  ;;  %v1796_v0 = vpop.permute.xlu0 %793  ;;  %v543_v45 = vadd.f32 %v1528_v28, %v414_v46  ;;  %v416_v22 = vadd.f32 %v1438_v50, %v287_v8  ;;  %v673_v28 = vadd.f32 %v1622_v21, %v544_v9  ;;  %v163_v21 = vadd.f32 %v2115_v43, %v34_v37  ;;  %v2132_v37 = vld [vmem:[#allocation31_spill] sm:$0xff]  ;;  %v2138_v43 = vld [vmem:[#allocation13_spill] sm:$0xff] }
 0x203   :  { %v671_v2 = vadd.f32 %v1616_v34, %v542_v5  ;;  %v799_v57 = vadd.f32 %v1722_v36, %v670_v19  ;;  %v161_v34 = vadd.f32 %v1250_v12, %v32_v25  ;;  %v417_v61 = vadd.f32 %v1436_v51, %v288_v59  ;;  %v2121_v5 = vld [vmem:[#allocation28_spill] sm:$0xff]  ;;  %v2125_v25 = vld [vmem:[#allocation10_spill] sm:$0xff]  ;;  %v2128_v59 = vld [vmem:[#allocation51_spill] sm:$0xff] }
 0x204   :  { %v289_v12 = vadd.f32 %v1348_v31, %v160_v35  ;;  %v545_v51 = vadd.f32 %v1534_v54, %v416_v22  ;;  %v802_v50 = vadd.f32 %v1726_v17, %v673_v28  ;;  %v292_v56 = vadd.f32 %v2121_v5, %v163_v21  ;;  %v2133_v28 = vld [vmem:[#allocation72_spill] sm:$0xff]  ;;  %v2144_v5 = vld [vmem:[#allocation33_spill] sm:$0xff] }
 0x205   :  { %v800_v44 = vadd.f32 %v1720_v27, %v671_v2  ;;  %v672_v27 = vadd.f32 %v1624_v20, %v543_v45  ;;  %v290_v63 = vadd.f32 %v1346_v30, %v161_v34  ;;  %v546_v13 = vadd.f32 %v1532_v55, %v417_v61  ;;  %v35_v55 = vld [vmem:[#allocation2 + $0x60] sm:$0xff]  ;;  %v2126_v2 = vld [vmem:[#allocation11_spill] sm:$0xff]  ;;  %v2129_v34 = vld [vmem:[#allocation94_spill] sm:$0xff] }
 0x206   :  { %v865_v38 = vpop.permute.xlu1 %864  ;;  %v863_v14 = vpop.permute.xlu0 %862  ;;  %v162_v20 = vadd.f32 %v2116_v60, %v33_v29  ;;  %v418_v30 = vadd.f32 %v2118_v49, %v289_v12  ;;  %v674_v17 = vadd.f32 %v2120_v3, %v545_v51  ;;  %v165_v15 = vadd.f32 %v2125_v25, %v36_v7  ;;  %v2130_v61 = vld [vmem:[#allocation95_spill] sm:$0xff]  ;;  %v2139_v60 = vld [vmem:[#allocation52_spill] sm:$0xff]  ;;  %v2149_v25 = vld [vmem:[#allocation14_spill] sm:$0xff] }
 0x207   :  { %v927_v39 = vadd.f32 %v865_v38, %v798_v42  ;;  %v926_v58 = vadd.f32 %v863_v14, %v797_v33  ;;  %v801_v11 = vadd.f32 %v1728_v40, %v672_v27  ;;  %v419_v52 = vadd.f32 %v2117_v41, %v290_v63  ;;  %v2122_v42 = vld [vmem:[#allocation29_spill] sm:$0xff]  ;;  %v2135_v63 = vld [vmem:[#allocation118_spill] sm:$0xff]  ;;  %v2141_v7 = vld [vmem:[#allocation96_spill] sm:$0xff] }
 0x208   :  { %v675_v54 = vadd.f32 %v2119_v32, %v546_v13  ;;  %v291_v33 = vadd.f32 %v2122_v42, %v162_v20  ;;  %v547_v46 = vadd.f32 %v2124_v47, %v418_v30  ;;  %v803_v14 = vadd.f32 %v1734_v53, %v674_v17  ;;  %v2136_v13 = vld [vmem:[#allocation119_spill] sm:$0xff]  ;;  %v2140_v41 = vld [vmem:[#allocation53_spill] sm:$0xff]  ;;  %v2145_v42 = vld [vmem:[#allocation74_spill] sm:$0xff] }
 0x209   :  { %959 = vst [vmem:[#allocation5 + $0x8] sm:$0xff] %v927_v39  ;;  %958 = vst [vmem:[#allocation5] sm:$0xff] %v926_v58  ;;  %v548_v10 = vadd.f32 %v2123_v48, %v419_v52  ;;  %v164_v19 = vadd.f32 %v2126_v2, %v35_v55  ;;  %v2127_v39 = vld [vmem:[#allocation50_spill] sm:$0xff]  ;;  %v2142_v32 = vld [vmem:[#allocation97_spill] sm:$0xff] }
 0x20a   :  { %v869_v1 = vpop.permute.xlu1 %868  ;;  %v867_v23 = vpop.permute.xlu0 %866  ;;  %v804_v38 = vadd.f32 %v1732_v16, %v675_v54  ;;  %v421_v58 = vadd.f32 %v2127_v39, %v292_v56  ;;  %v420_v8 = vadd.f32 %v2128_v59, %v291_v33  ;;  %v676_v16 = vadd.f32 %v2130_v61, %v547_v46  ;;  %v2146_v48 = vld [vmem:[#allocation75_spill] sm:$0xff]  ;;  %v2147_v47 = vld [vmem:[#allocation120_spill] sm:$0xff]  ;;  %v2151_v39 = vld [vmem:[#allocation54_spill] sm:$0xff] }
 0x20b   :  { %v929_v62 = vadd.f32 %v869_v1, %v800_v44  ;;  %v928_v36 = vadd.f32 %v867_v23, %v799_v57  ;;  %v38_v44 = vld [vmem:[#allocation2 + $0x78] sm:$0xff]  ;;  %v37_v57 = vld [vmem:[#allocation2 + $0x70] sm:$0xff]  ;;  %v677_v35 = vadd.f32 %v2129_v34, %v548_v10  ;;  %v293_v29 = vadd.f32 %v2132_v37, %v164_v19 }
 0x20c   :  { %v2131_v1 = vld [vmem:[#allocation30_spill] sm:$0xff]  ;;  %v550_v27 = vadd.f32 %v2133_v28, %v421_v58  ;;  %v805_v51 = vadd.f32 %v2136_v13, %v676_v16  ;;  %v166_v21 = vadd.f32 %v2138_v43, %v37_v57  ;;  %v2150_v2 = vld [vmem:[#allocation15_spill] sm:$0xff]  ;;  %v2157_v28 = vld [vmem:[#allocation76_spill] sm:$0xff] }
 0x20d   :  { %961 = vst [vmem:[#allocation5 + $0x18] sm:$0xff] %v929_v62  ;;  %960 = vst [vmem:[#allocation5 + $0x10] sm:$0xff] %v928_v36  ;;  %v294_v23 = vadd.f32 %v2131_v1, %v165_v15  ;;  %v2134_v62 = vld [vmem:[#allocation73_spill] sm:$0xff]  ;;  %v806_v12 = vadd.f32 %v2135_v63, %v677_v35  ;;  %v422_v52 = vadd.f32 %v2140_v41, %v293_v29  ;;  %v2152_v59 = vld [vmem:[#allocation55_spill] sm:$0xff] }
 0x20e   :  { %v873_v6 = vpop.permute.xlu1 %872  ;;  %v871_v31 = vpop.permute.xlu0 %870  ;;  %v549_v36 = vadd.f32 %v2134_v62, %v420_v8  ;;  %v679_v55 = vadd.f32 %v2141_v7, %v550_v27  ;;  %v295_v56 = vadd.f32 %v2144_v5, %v166_v21  ;;  %v41_v57 = vld [vmem:[#allocation2 + $0x90] sm:$0xff]  ;;  %v2154_v61 = vld [vmem:[#allocation99_spill] sm:$0xff]  ;;  %v2158_v62 = vld [vmem:[#allocation77_spill] sm:$0xff] }
 0x20f   :  { %v931_v4 = vadd.f32 %v873_v6, %v802_v50  ;;  %v930_v40 = vadd.f32 %v871_v31, %v801_v11  ;;  %v2137_v50 = vld [vmem:[#allocation12_spill] sm:$0xff]  ;;  %v423_v20 = vadd.f32 %v2139_v60, %v294_v23  ;;  %v40_v6 = vld [vmem:[#allocation2 + $0x88] sm:$0xff]  ;;  %v551_v10 = vadd.f32 %v2146_v48, %v422_v52  ;;  %v2153_v34 = vld [vmem:[#allocation98_spill] sm:$0xff] }
 0x210   :  { %v167_v11 = vadd.f32 %v2137_v50, %v38_v44  ;;  %v39_v31 = vld [vmem:[#allocation2 + $0x80] sm:$0xff]  ;;  %v678_v54 = vadd.f32 %v2142_v32, %v549_v36  ;;  %v808_v46 = vadd.f32 %v2147_v47, %v679_v55  ;;  %v169_v15 = vadd.f32 %v2149_v25, %v40_v6  ;;  %v42_v44 = vld [vmem:[#allocation2 + $0x98] sm:$0xff]  ;;  %v2155_v1 = vld [vmem:[#allocation34_spill] sm:$0xff] }
 0x211   :  { %963 = vst [vmem:[#allocation5 + $0x28] sm:$0xff] %v931_v4  ;;  %962 = vst [vmem:[#allocation5 + $0x20] sm:$0xff] %v930_v40  ;;  %v2143_v4 = vld [vmem:[#allocation32_spill] sm:$0xff]  ;;  %v552_v33 = vadd.f32 %v2145_v42, %v423_v20  ;;  %v168_v19 = vadd.f32 %v2150_v2, %v39_v31  ;;  %v424_v8 = vadd.f32 %v2152_v59, %v295_v56  ;;  %v2156_v37 = vld [vmem:[#allocation35_spill] sm:$0xff] }
 0x212   :  { %v877_v9 = vpop.permute.xlu1 %876  ;;  %v875_v45 = vpop.permute.xlu0 %874  ;;  %v296_v40 = vadd.f32 %v2143_v4, %v167_v11  ;;  %v680_v16 = vadd.f32 %v2154_v61, %v551_v10  ;;  %v298_v23 = vadd.f32 %v2155_v1, %v169_v15  ;;  %v2159_v63 = vld [vmem:[#allocation122_spill] sm:$0xff]  ;;  %v2160_v13 = vld [vmem:[#allocation123_spill] sm:$0xff]  ;;  %v2161_v50 = vld [vmem:[#allocation16_spill] sm:$0xff] }
 0x213   :  { %v933_v22 = vadd.f32 %v877_v9, %v804_v38  ;;  %v932_v53 = vadd.f32 %v875_v45, %v803_v14  ;;  %v2148_v38 = vld [vmem:[#allocation121_spill] sm:$0xff]  ;;  %v681_v35 = vadd.f32 %v2153_v34, %v552_v33  ;;  %v297_v29 = vadd.f32 %v2156_v37, %v168_v19  ;;  %v2163_v60 = vld [vmem:[#allocation56_spill] sm:$0xff]  ;;  %v2169_v42 = vld [vmem:[#allocation78_spill] sm:$0xff] }
 0x214   :  { %v807_v14 = vadd.f32 %v2148_v38, %v678_v54  ;;  %v425_v58 = vadd.f32 %v2151_v39, %v296_v40  ;;  %v553_v36 = vadd.f32 %v2158_v62, %v424_v8  ;;  %v171_v11 = vadd.f32 %v2161_v50, %v42_v44  ;;  %v2162_v43 = vld [vmem:[#allocation17_spill] sm:$0xff]  ;;  %v43_v31 = vld [vmem:[#allocation2 + $0xa0] sm:$0xff]  ;;  %v2170_v48 = vld [vmem:[#allocation79_spill] sm:$0xff] }
 0x215   :  { %965 = vst [vmem:[#allocation5 + $0x38] sm:$0xff] %v933_v22  ;;  %964 = vst [vmem:[#allocation5 + $0x30] sm:$0xff] %v932_v53  ;;  %v170_v21 = vadd.f32 %v2162_v43, %v41_v57  ;;  %v427_v20 = vadd.f32 %v2163_v60, %v298_v23  ;;  %v2164_v41 = vld [vmem:[#allocation57_spill] sm:$0xff]  ;;  %v2165_v7 = vld [vmem:[#allocation100_spill] sm:$0xff] }
 0x216   :  { %v881_v49 = vpop.permute.xlu1 %880  ;;  %v879_v30 = vpop.permute.xlu0 %878  ;;  %v554_v27 = vadd.f32 %v2157_v28, %v425_v58  ;;  %v426_v52 = vadd.f32 %v2164_v41, %v297_v29  ;;  %v44_v6 = vld [vmem:[#allocation2 + $0xa8] sm:$0xff]  ;;  %v2167_v4 = vld [vmem:[#allocation36_spill] sm:$0xff]  ;;  %v2173_v25 = vld [vmem:[#allocation18_spill] sm:$0xff] }
 0x217   :  { %v935_v3 = vadd.f32 %v881_v49, %v806_v12  ;;  %v934_v17 = vadd.f32 %v879_v30, %v805_v51  ;;  %v810_v12 = vadd.f32 %v2159_v63, %v681_v35  ;;  %v809_v51 = vadd.f32 %v2160_v13, %v680_v16  ;;  %v2166_v32 = vld [vmem:[#allocation101_spill] sm:$0xff]  ;;  %v2171_v47 = vld [vmem:[#allocation124_spill] sm:$0xff]  ;;  %v2174_v2 = vld [vmem:[#allocation19_spill] sm:$0xff] }
 0x218   :  { %v683_v55 = vadd.f32 %v2165_v7, %v554_v27  ;;  %v682_v54 = vadd.f32 %v2166_v32, %v553_v36  ;;  %v300_v40 = vadd.f32 %v2167_v4, %v171_v11  ;;  %v2168_v5 = vld [vmem:[#allocation37_spill] sm:$0xff]  ;;  %v556_v33 = vadd.f32 %v2169_v42, %v427_v20  ;;  %v2175_v39 = vld [vmem:[#allocation58_spill] sm:$0xff]  ;;  %v2176_v59 = vld [vmem:[#allocation59_spill] sm:$0xff] }
 0x219   :  { %967 = vst [vmem:[#allocation5 + $0x48] sm:$0xff] %v935_v3  ;;  %966 = vst [vmem:[#allocation5 + $0x40] sm:$0xff] %v934_v17  ;;  %v299_v56 = vadd.f32 %v2168_v5, %v170_v21  ;;  %v555_v10 = vadd.f32 %v2170_v48, %v426_v52  ;;  %v2172_v38 = vld [vmem:[#allocation125_spill] sm:$0xff]  ;;  %v173_v15 = vadd.f32 %v2173_v25, %v44_v6  ;;  %v46_v44 = vld [vmem:[#allocation2 + $0xb8] sm:$0xff] }
 0x21a   :  { %v885_v9 = vpop.permute.xlu1 %884  ;;  %v883_v45 = vpop.permute.xlu0 %882  ;;  %v172_v19 = vadd.f32 %v2174_v2, %v43_v31  ;;  %v429_v58 = vadd.f32 %v2175_v39, %v300_v40  ;;  %v45_v57 = vld [vmem:[#allocation2 + $0xb0] sm:$0xff]  ;;  %v2178_v61 = vld [vmem:[#allocation103_spill] sm:$0xff]  ;;  %v2181_v28 = vld [vmem:[#allocation80_spill] sm:$0xff] }
 0x21b   :  { %v937_v22 = vadd.f32 %v885_v9, %v808_v46  ;;  %v936_v53 = vadd.f32 %v883_v45, %v807_v14  ;;  %v812_v46 = vadd.f32 %v2171_v47, %v683_v55  ;;  %v811_v14 = vadd.f32 %v2172_v38, %v682_v54  ;;  %v2177_v34 = vld [vmem:[#allocation102_spill] sm:$0xff]  ;;  %v2180_v37 = vld [vmem:[#allocation39_spill] sm:$0xff]  ;;  %v2182_v62 = vld [vmem:[#allocation81_spill] sm:$0xff] }
 0x21c   :  { %v428_v8 = vadd.f32 %v2176_v59, %v299_v56  ;;  %v685_v35 = vadd.f32 %v2177_v34, %v556_v33  ;;  %v684_v16 = vadd.f32 %v2178_v61, %v555_v10  ;;  %v2179_v1 = vld [vmem:[#allocation38_spill] sm:$0xff]  ;;  %v301_v29 = vadd.f32 %v2180_v37, %v172_v19  ;;  %v2184_v13 = vld [vmem:[#allocation127_spill] sm:$0xff]  ;;  %v2185_v50 = vld [vmem:[#allocation20_spill] sm:$0xff] }
 0x21d   :  { %969 = vst [vmem:[#allocation5 + $0x58] sm:$0xff] %v937_v22  ;;  %968 = vst [vmem:[#allocation5 + $0x50] sm:$0xff] %v936_v53  ;;  %v302_v23 = vadd.f32 %v2179_v1, %v173_v15  ;;  %v558_v27 = vadd.f32 %v2181_v28, %v429_v58  ;;  %v2183_v63 = vld [vmem:[#allocation126_spill] sm:$0xff]  ;;  %v175_v11 = vadd.f32 %v2185_v50, %v46_v44  ;;  %v2186_v43 = vld [vmem:[#allocation21_spill] sm:$0xff] }
 0x21e   :  { %v889_v49 = vpop.permute.xlu1 %888  ;;  %v887_v30 = vpop.permute.xlu0 %886  ;;  %v557_v36 = vadd.f32 %v2182_v62, %v428_v8  ;;  %v174_v21 = vadd.f32 %v2186_v43, %v45_v57  ;;  %v2187_v60 = vld [vmem:[#allocation60_spill] sm:$0xff]  ;;  %v2188_v41 = vld [vmem:[#allocation61_spill] sm:$0xff]  ;;  %v2193_v42 = vld [vmem:[#allocation82_spill] sm:$0xff] }
 0x21f   :  { %v939_v3 = vadd.f32 %v889_v49, %v810_v12  ;;  %v938_v17 = vadd.f32 %v887_v30, %v809_v51  ;;  %v814_v12 = vadd.f32 %v2183_v63, %v685_v35  ;;  %v813_v51 = vadd.f32 %v2184_v13, %v684_v16  ;;  %v48_v6 = vld [vmem:[#allocation2 + $0xc8] sm:$0xff]  ;;  %v47_v31 = vld [vmem:[#allocation2 + $0xc0] sm:$0xff]  ;;  %v2194_v48 = vld [vmem:[#allocation83_spill] sm:$0xff] }
 0x220   :  { %v431_v20 = vadd.f32 %v2187_v60, %v302_v23  ;;  %v430_v52 = vadd.f32 %v2188_v41, %v301_v29  ;;  %v2189_v7 = vld [vmem:[#allocation104_spill] sm:$0xff]  ;;  %v2190_v32 = vld [vmem:[#allocation105_spill] sm:$0xff]  ;;  %v2197_v25 = vld [vmem:[#allocation22_spill] sm:$0xff] }
 0x221   :  { %971 = vst [vmem:[#allocation5 + $0x68] sm:$0xff] %v939_v3  ;;  %970 = vst [vmem:[#allocation5 + $0x60] sm:$0xff] %v938_v17  ;;  %v687_v55 = vadd.f32 %v2189_v7, %v558_v27  ;;  %v686_v54 = vadd.f32 %v2190_v32, %v557_v36  ;;  %v2191_v4 = vld [vmem:[#allocation40_spill] sm:$0xff]  ;;  %v2192_v5 = vld [vmem:[#allocation41_spill] sm:$0xff]  ;;  %v177_v15 = vadd.f32 %v2197_v25, %v48_v6 }
 0x222   :  { %v893_v9 = vpop.permute.xlu1 %892  ;;  %v891_v45 = vpop.permute.xlu0 %890  ;;  %v304_v40 = vadd.f32 %v2191_v4, %v175_v11  ;;  %v303_v56 = vadd.f32 %v2192_v5, %v174_v21  ;;  %v560_v33 = vadd.f32 %v2193_v42, %v431_v20  ;;  %v559_v10 = vadd.f32 %v2194_v48, %v430_v52  ;;  %v2195_v47 = vld [vmem:[#allocation128_spill] sm:$0xff]  ;;  %v2196_v38 = vld [vmem:[#allocation129_spill] sm:$0xff]  ;;  %v2198_v2 = vld [vmem:[#allocation23_spill] sm:$0xff] }
 0x223   :  { %v941_v22 = vadd.f32 %v893_v9, %v812_v46  ;;  %v940_v53 = vadd.f32 %v891_v45, %v811_v14  ;;  %v816_v46 = vadd.f32 %v2195_v47, %v687_v55  ;;  %v815_v14 = vadd.f32 %v2196_v38, %v686_v54  ;;  %v2199_v39 = vld [vmem:[#allocation62_spill] sm:$0xff]  ;;  %v2200_v59 = vld [vmem:[#allocation63_spill] sm:$0xff]  ;;  %v2205_v28 = vld [vmem:[#allocation84_spill] sm:$0xff] }
 0x224   :  { %v176_v19 = vadd.f32 %v2198_v2, %v47_v31  ;;  %v433_v58 = vadd.f32 %v2199_v39, %v304_v40  ;;  %v432_v8 = vadd.f32 %v2200_v59, %v303_v56  ;;  %v50_v44 = vld [vmem:[#allocation2 + $0xd8] sm:$0xff]  ;;  %v49_v57 = vld [vmem:[#allocation2 + $0xd0] sm:$0xff]  ;;  %v2206_v62 = vld [vmem:[#allocation85_spill] sm:$0xff] }
 0x225   :  { %973 = vst [vmem:[#allocation5 + $0x78] sm:$0xff] %v941_v22  ;;  %972 = vst [vmem:[#allocation5 + $0x70] sm:$0xff] %v940_v53  ;;  %v2201_v34 = vld [vmem:[#allocation106_spill] sm:$0xff]  ;;  %v2202_v61 = vld [vmem:[#allocation107_spill] sm:$0xff] }
 0x226   :  { %v897_v49 = vpop.permute.xlu1 %896  ;;  %v895_v30 = vpop.permute.xlu0 %894  ;;  %v689_v35 = vadd.f32 %v2201_v34, %v560_v33  ;;  %v688_v16 = vadd.f32 %v2202_v61, %v559_v10  ;;  %v2203_v1 = vld [vmem:[#allocation42_spill] sm:$0xff]  ;;  %v2204_v37 = vld [vmem:[#allocation43_spill] sm:$0xff]  ;;  %v562_v27 = vadd.f32 %v2205_v28, %v433_v58  ;;  %v561_v36 = vadd.f32 %v2206_v62, %v432_v8  ;;  %v2209_v50 = vld [vmem:[#allocation24_spill] sm:$0xff] }
 0x227   :  { %v943_v3 = vadd.f32 %v897_v49, %v814_v12  ;;  %v942_v17 = vadd.f32 %v895_v30, %v813_v51  ;;  %v306_v23 = vadd.f32 %v2203_v1, %v177_v15  ;;  %v305_v29 = vadd.f32 %v2204_v37, %v176_v19  ;;  %v2207_v63 = vld [vmem:[#allocation130_spill] sm:$0xff]  ;;  %v2208_v13 = vld [vmem:[#allocation131_spill] sm:$0xff]  ;;  %v2210_v43 = vld [vmem:[#allocation25_spill] sm:$0xff] }
 0x228   :  { %v818_v12 = vadd.f32 %v2207_v63, %v689_v35  ;;  %v817_v51 = vadd.f32 %v2208_v13, %v688_v16  ;;  %v179_v11 = vadd.f32 %v2209_v50, %v50_v44  ;;  %v178_v21 = vadd.f32 %v2210_v43, %v49_v57  ;;  %v2211_v60 = vld [vmem:[#allocation64_spill] sm:$0xff]  ;;  %v2212_v41 = vld [vmem:[#allocation65_spill] sm:$0xff]  ;;  %v2217_v42 = vld [vmem:[#allocation86_spill] sm:$0xff] }
 0x229   :  { %975 = vst [vmem:[#allocation5 + $0x88] sm:$0xff] %v943_v3  ;;  %974 = vst [vmem:[#allocation5 + $0x80] sm:$0xff] %v942_v17  ;;  %v435_v20 = vadd.f32 %v2211_v60, %v306_v23  ;;  %v434_v52 = vadd.f32 %v2212_v41, %v305_v29  ;;  %v52_v6 = vld [vmem:[#allocation2 + $0xe8] sm:$0xff]  ;;  %v51_v31 = vld [vmem:[#allocation2 + $0xe0] sm:$0xff] }
 0x22a   :  { %v901_v9 = vpop.permute.xlu1 %900  ;;  %v899_v45 = vpop.permute.xlu0 %898  ;;  %v2213_v7 = vld [vmem:[#allocation108_spill] sm:$0xff]  ;;  %v2214_v32 = vld [vmem:[#allocation109_spill] sm:$0xff]  ;;  %v2218_v48 = vld [vmem:[#allocation87_spill] sm:$0xff] }
 0x22b   :  { %v945_v22 = vadd.f32 %v901_v9, %v816_v46  ;;  %v944_v53 = vadd.f32 %v899_v45, %v815_v14  ;;  %v691_v55 = vadd.f32 %v2213_v7, %v562_v27  ;;  %v690_v54 = vadd.f32 %v2214_v32, %v561_v36  ;;  %v2215_v4 = vld [vmem:[#allocation44_spill] sm:$0xff]  ;;  %v2216_v5 = vld [vmem:[#allocation45_spill] sm:$0xff]  ;;  %v2221_v25 = vld [vmem:[#allocation26_spill] sm:$0xff] }
 0x22c   :  { %v308_v40 = vadd.f32 %v2215_v4, %v179_v11  ;;  %v307_v56 = vadd.f32 %v2216_v5, %v178_v21  ;;  %v564_v33 = vadd.f32 %v2217_v42, %v435_v20  ;;  %v563_v10 = vadd.f32 %v2218_v48, %v434_v52  ;;  %v2219_v47 = vld [vmem:[#allocation132_spill] sm:$0xff]  ;;  %v2220_v38 = vld [vmem:[#allocation133_spill] sm:$0xff]  ;;  %v2222_v2 = vld [vmem:[#allocation27_spill] sm:$0xff] }
 0x22d   :  { %977 = vst [vmem:[#allocation5 + $0x98] sm:$0xff] %v945_v22  ;;  %976 = vst [vmem:[#allocation5 + $0x90] sm:$0xff] %v944_v53  ;;  %v820_v46 = vadd.f32 %v2219_v47, %v691_v55  ;;  %v819_v14 = vadd.f32 %v2220_v38, %v690_v54  ;;  %v181_v15 = vadd.f32 %v2221_v25, %v52_v6  ;;  %v2223_v39 = vld [vmem:[#allocation66_spill] sm:$0xff]  ;;  %v2224_v59 = vld [vmem:[#allocation67_spill] sm:$0xff] }
 0x22e   :  { %v905_v49 = vpop.permute.xlu1 %904  ;;  %v903_v30 = vpop.permute.xlu0 %902  ;;  %v180_v19 = vadd.f32 %v2222_v2, %v51_v31  ;;  %v437_v58 = vadd.f32 %v2223_v39, %v308_v40  ;;  %v436_v8 = vadd.f32 %v2224_v59, %v307_v56  ;;  %v2225_v44 = vld [vmem:[#allocation110_spill] sm:$0xff]  ;;  %v2226_v34 = vld [vmem:[#allocation111_spill] sm:$0xff]  ;;  %v2229_v37 = vld [vmem:[#allocation88_spill] sm:$0xff] }
 0x22f   :  { %v947_v3 = vadd.f32 %v905_v49, %v818_v12  ;;  %v946_v17 = vadd.f32 %v903_v30, %v817_v51  ;;  %v693_v57 = vadd.f32 %v2225_v44, %v564_v33  ;;  %v692_v35 = vadd.f32 %v2226_v34, %v563_v10  ;;  %v2227_v22 = vld [vmem:[#allocation46_spill] sm:$0xff]  ;;  %v2228_v1 = vld [vmem:[#allocation47_spill] sm:$0xff]  ;;  %v2230_v28 = vld [vmem:[#allocation89_spill] sm:$0xff] }
 0x230   :  { %v310_v53 = vadd.f32 %v2227_v22, %v181_v15  ;;  %v309_v23 = vadd.f32 %v2228_v1, %v180_v19  ;;  %v566_v29 = vadd.f32 %v2229_v37, %v437_v58  ;;  %v565_v27 = vadd.f32 %v2230_v28, %v436_v8  ;;  %v2231_v62 = vld [vmem:[#allocation134_spill] sm:$0xff]  ;;  %v2232_v63 = vld [vmem:[#allocation135_spill] sm:$0xff]  ;;  %v2233_v13 = vld [vmem:[#allocation68_spill] sm:$0xff] }
 0x231   :  { %979 = vst [vmem:[#allocation5 + $0xa8] sm:$0xff] %v947_v3  ;;  %978 = vst [vmem:[#allocation5 + $0xa0] sm:$0xff] %v946_v17  ;;  %v822_v36 = vadd.f32 %v2231_v62, %v693_v57  ;;  %v821_v12 = vadd.f32 %v2232_v63, %v692_v35  ;;  %v2234_v50 = vld [vmem:[#allocation69_spill] sm:$0xff]  ;;  %v2235_v60 = vld [vmem:[#allocation112_spill] sm:$0xff] }
 0x232   :  { %v909_v9 = vpop.permute.xlu1 %908  ;;  %v907_v45 = vpop.permute.xlu0 %906  ;;  %v439_v51 = vadd.f32 %v2233_v13, %v310_v53  ;;  %v438_v11 = vadd.f32 %v2234_v50, %v309_v23  ;;  %v695_v20 = vadd.f32 %v2235_v60, %v566_v29  ;;  %v2236_v41 = vld [vmem:[#allocation113_spill] sm:$0xff]  ;;  %v2237_v6 = vld [vmem:[#allocation90_spill] sm:$0xff]  ;;  %v2238_v7 = vld [vmem:[#allocation91_spill] sm:$0xff] }
 0x233   :  { %v949_v61 = vadd.f32 %v909_v9, %v820_v46  ;;  %v948_v16 = vadd.f32 %v907_v45, %v819_v14  ;;  %v694_v52 = vadd.f32 %v2236_v41, %v565_v27  ;;  %v2239_v32 = vld [vmem:[#allocation136_spill] sm:$0xff]  ;;  %v2240_v3 = vld [vmem:[#allocation137_spill] sm:$0xff]  ;;  %v2241_v5 = vld [vmem:[#allocation114_spill] sm:$0xff] }
 0x234   :  { %v568_v31 = vadd.f32 %v2237_v6, %v439_v51  ;;  %v567_v55 = vadd.f32 %v2238_v7, %v438_v11  ;;  %v824_v54 = vadd.f32 %v2239_v32, %v695_v20  ;;  %v2242_v42 = vld [vmem:[#allocation115_spill] sm:$0xff]  ;;  %v2243_v2 = vld [vmem:[#allocation116_spill] sm:$0xff]  ;;  %v2244_v39 = vld [vmem:[#allocation117_spill] sm:$0xff] }
 0x235   :  { %981 = vst [vmem:[#allocation5 + $0xb8] sm:$0xff] %v949_v61  ;;  %980 = vst [vmem:[#allocation5 + $0xb0] sm:$0xff] %v948_v16  ;;  %v823_v17 = vadd.f32 %v2240_v3, %v694_v52  ;;  %v828_v19 = vadd.f32 %v1794_v24, %v2243_v2  ;;  %v827_v58 = vadd.f32 %v1796_v0, %v2244_v39 }
 0x236   :  { %v913_v43 = vpop.permute.xlu1 %912  ;;  %v911_v21 = vpop.permute.xlu0 %910  ;;  %v697_v56 = vadd.f32 %v2241_v5, %v568_v31  ;;  %v696_v33 = vadd.f32 %v2242_v42, %v567_v55 }
 0x237   :  { %v951_v49 = vadd.f32 %v913_v43, %v822_v36  ;;  %v950_v30 = vadd.f32 %v911_v21, %v821_v12 }
 0x238   :  { %v826_v47 = vadd.f32 %v1780_v26, %v697_v56  ;;  %v825_v46 = vadd.f32 %v1782_v18, %v696_v33 }
 0x239   :  { %983 = vst [vmem:[#allocation5 + $0xc8] sm:$0xff] %v951_v49  ;;  %982 = vst [vmem:[#allocation5 + $0xc0] sm:$0xff] %v950_v30 }
 0x23a   :  { %v917_v4 = vpop.permute.xlu1 %916  ;;  %v915_v40 = vpop.permute.xlu0 %914 }
 0x23b   :  { %v953_v48 = vadd.f32 %v917_v4, %v824_v54  ;;  %v952_v10 = vadd.f32 %v915_v40, %v823_v17 }
 0x23d   :  { %985 = vst [vmem:[#allocation5 + $0xd8] sm:$0xff] %v953_v48  ;;  %984 = vst [vmem:[#allocation5 + $0xd0] sm:$0xff] %v952_v10 }
 0x23e   :  { %v921_v38 = vpop.permute.xlu1 %920  ;;  %v919_v14 = vpop.permute.xlu0 %918 }
 0x23f   :  { %v955_v25 = vadd.f32 %v921_v38, %v826_v47  ;;  %v954_v15 = vadd.f32 %v919_v14, %v825_v46 }
 0x241   :  { %987 = vst [vmem:[#allocation5 + $0xe8] sm:$0xff] %v955_v25  ;;  %986 = vst [vmem:[#allocation5 + $0xe0] sm:$0xff] %v954_v15 }
 0x242   :  { %v925_v59 = vpop.permute.xlu1 %924  ;;  %v923_v26 = vpop.permute.xlu0 %922 }
 0x243   :  { %v957_v8 = vadd.f32 %v925_v59, %v828_v19  ;;  %v956_v18 = vadd.f32 %v923_v26, %v827_v58 }
 0x245   :  { %989 = vst [vmem:[#allocation5 + $0xf8] sm:$0xff] %v957_v8  ;;  %988 = vst [vmem:[#allocation5 + $0xf0] sm:$0xff] %v956_v18 }
 0x246   :  { %1117 = shalt.err (!%p1114_p12)
}
 0x247   :  { %s1118_s2 = scalar_lea.hbm %s1984_s1, 8192 }
 0x248   :  { %p1119_p13 = scmp.ne.s32.totalorder %s1984_s1, %s1118_s2  ;;  %p1122_p0 = scmp.lt.u32.totalorder %s1118_s2, %s1984_s1 }
 0x24a   :  { %p1124_p1 = pnand %p1122_p0, %p1119_p13 }
 0x24c   :  { %1127 = shalt.err (!%p1124_p1)
}
 0x24d   :  { %1067 = dma.vmem_to_hbm [thread:$0]  %s1062_s27, 8192, %s1984_s1, [#allocation4], %s1133_s16, %s1133_s16, %s1134_s17  }
 0x24e   :  { %1130 = dma.done.wait [#allocation4], 8192  }
 0x24f   :  { %1131 = vsyncadd [#allocation4], 4294959104 }
 0x250   :  { %1071 = vsyncpa [#allocation3], 1 }
 0x251   :  { %1072 = vsyncpa [#allocation4], 1 }

</bundles_post_ra>
